<compile_context>
chip_gen: v6e
topology: v6e:2x2x1
jax: 0.10.0
libtpu: 0.0.40
codegen_flags: <defaults>
</compile_context>

<pallas_src>
import functools
import math

import jax
import jax.numpy as jnp
from jax import lax
from jax.experimental import pallas as pl
from jax.experimental.pallas import tpu as pltpu


def _latent_memory_kernel(idx_ref,                    # SMEM scalar prefetch: (batch,) i32
                          batch_ref, tgt_ref,         # VMEM: (B,D) f32, (1,B) i32
                          mem_in_hbm, cs_in_ref,      # HBM ref (aliased), VMEM (C,D)
                          mem_out_hbm, cs_out_ref,    # HBM ref (aliased), VMEM (C,D)
                          gath, gsem, ssem,           # scratch: VMEM (B,D), DMA sems
                          *, batch_size, num_class, momentum):
    # ---- 1. DMA-gather the addressed rows of lat_memory (HBM -> VMEM scratch).
    # All gathers are issued up front so their latencies overlap.  Reads happen
    # before any scatter-back write, so duplicate idx entries see the original
    # memory (matches .at[idx].set semantics; torch leaves duplicates undefined).
    # Static Python loop is fine at this batch size; for batch >= ~32 switch to
    # lax.fori_loop / pl.loop to bound live ranges.
    gathers = []
    for i in range(batch_size):
        cp = pltpu.make_async_copy(mem_in_hbm.at[pl.ds(idx_ref[i], 1), :],
                                   gath.at[pl.ds(i, 1), :],
                                   gsem.at[i])
        cp.start()
        gathers.append(cp)

    # ---- 2. While the gathers are in flight, build the one-hot target matrix
    # (iota + compare: pure VALU work, independent of the gathered rows).
    onehot = (lax.broadcasted_iota(jnp.int32, (num_class, batch_size), 0)
              == tgt_ref[...]).astype(jnp.float32)               # (C, B)

    for cp in gathers:
        cp.wait()

    # ---- 3. Vectorized EMA mix + L2 normalize over the whole (batch, D) block.
    mixed = gath[...] * (1.0 - momentum) + batch_ref[...] * momentum
    sumsq = jnp.sum(mixed * mixed, axis=-1, keepdims=True)
    upd = mixed * lax.rsqrt(sumsq)            # rsqrt -> EUP; no f32 divide
    gath[...] = upd                           # stage updated rows for scatter

    # ---- 4. Issue the scatter-back DMAs NOW so the HBM writes overlap with the
    # class_sums MXU matmul below.  `gath` is not touched again after this.
    # TODO(synk): on v7x, split the batch across a leading "parallel" grid axis
    # to use both TensorCores once batch is large enough to matter.
    scatters = []
    for i in range(batch_size):
        cp = pltpu.make_async_copy(gath.at[pl.ds(i, 1), :],
                                   mem_out_hbm.at[pl.ds(idx_ref[i], 1), :],
                                   ssem.at[i])
        cp.start()
        scatters.append(cp)

    # ---- 5. class_sums scatter-add as a one-hot MXU matmul, accumulated into
    # the aliased class_sums block (handles duplicate targets by summation).
    cs_out_ref[...] = cs_in_ref[...] + jnp.dot(
        onehot, upd, preferred_element_type=jnp.float32)

    # ---- 6. Drain the scatters before the kernel retires.
    for cp in scatters:
        cp.wait()


def latent_memory_forward(lat_memory, class_sums, batch_samples, targets, idx,
                          momentum=0.9):
    n_data, feat_dim = lat_memory.shape
    num_class = class_sums.shape[0]
    batch_size = batch_samples.shape[0]

    kernel = functools.partial(_latent_memory_kernel, batch_size=batch_size,
                               num_class=num_class, momentum=momentum)

    idx = idx.astype(jnp.int32)
    targets_2d = targets.reshape(1, batch_size).astype(jnp.int32)

    mem_new, cs_new = pl.pallas_call(
        kernel,
        out_shape=(
            jax.ShapeDtypeStruct((n_data, feat_dim), lat_memory.dtype),
            jax.ShapeDtypeStruct((num_class, feat_dim), class_sums.dtype),
        ),
        grid_spec=pltpu.PrefetchScalarGridSpec(
            num_scalar_prefetch=1,          # idx -> SMEM for DMA row addressing
            grid=(1,),
            in_specs=[
                pl.BlockSpec((batch_size, feat_dim), lambda g, idx: (0, 0)),
                pl.BlockSpec((1, batch_size), lambda g, idx: (0, 0)),
                pl.BlockSpec(memory_space=pl.ANY),      # lat_memory stays in HBM
                pl.BlockSpec((num_class, feat_dim), lambda g, idx: (0, 0)),
            ],
            out_specs=[
                pl.BlockSpec(memory_space=pl.ANY),      # aliased lat_memory out
                pl.BlockSpec((num_class, feat_dim), lambda g, idx: (0, 0)),
            ],
            scratch_shapes=[
                pltpu.VMEM((batch_size, feat_dim), jnp.float32),
                pltpu.SemaphoreType.DMA((batch_size,)),
                pltpu.SemaphoreType.DMA((batch_size,)),
            ],
        ),
        # Operand numbering includes scalar-prefetch args:
        #   0=idx, 1=batch_samples, 2=targets_2d, 3=lat_memory, 4=class_sums
        input_output_aliases={3: 0, 4: 1},
        compiler_params=pltpu.CompilerParams(
            dimension_semantics=("arbitrary",)),
    )(idx, batch_samples, targets_2d, lat_memory, class_sums)

    return mem_new, cs_new


if __name__ == "__main__":
    # Small, sublane/lane-aligned shapes.
    n_data, feat_dim, num_class, batch = 64, 128, 8, 8
    momentum = 0.9

    key = jax.random.PRNGKey(0)
    k1, k2, k3, k4 = jax.random.split(key, 4)

    # Deterministic buffer init mirroring the module's __init__:
    #   torch.randn(n_data, feat_dim).mul_(2*stdv).add_(-stdv)
    stdv = 1.0 / math.sqrt(feat_dim / 3)
    lat_memory = (jax.random.normal(k1, (n_data, feat_dim), jnp.float32)
                  * (2.0 * stdv) - stdv)
    class_sums = jnp.zeros((num_class, feat_dim), jnp.float32)

    batch_samples = jax.random.normal(k2, (batch, feat_dim), jnp.float32)
    targets = jax.random.randint(k3, (batch,), 0, num_class, dtype=jnp.int32)
    # unique dataset indices (index_copy_ with duplicates is undefined in torch)
    idx = jax.random.choice(k4, n_data, shape=(batch,), replace=False).astype(jnp.int32)

    # Pure-JAX reference of the forward semantics (computed BEFORE the kernel
    # call so donated/aliased buffers cannot perturb it).
    gathered = lat_memory[idx]
    mixed = gathered * (1.0 - momentum) + batch_samples * momentum
    upd = mixed / jnp.sqrt(jnp.sum(mixed * mixed, axis=1, keepdims=True))
    mem_ref_v = lat_memory.at[idx].set(upd)
    cs_ref_v = class_sums.at[targets].add(upd)
    jax.block_until_ready((mem_ref_v, cs_ref_v))

    mem_new, cs_new = latent_memory_forward(
        lat_memory, class_sums, batch_samples, targets, idx, momentum)
    jax.block_until_ready((mem_new, cs_new))

    assert jnp.allclose(mem_new, mem_ref_v, rtol=1e-5, atol=1e-5)
    assert jnp.allclose(cs_new, cs_ref_v, rtol=1e-5, atol=1e-5)
    print("KERNEL_OK")
</pallas_src>

<mosaic_0001>
module attributes {stable_mosaic.version = 11 : i64} {
  func.func @_latent_memory_kernel(%arg0: i32, %arg1: memref<8xi32, #tpu.memory_space<smem>>, %arg2: memref<8x128xf32, #tpu.memory_space<vmem>>, %arg3: memref<1x8xi32, #tpu.memory_space<vmem>>, %arg4: memref<64x128xf32, #tpu.memory_space<any>>, %arg5: memref<8x128xf32, #tpu.memory_space<vmem>>, %arg6: memref<64x128xf32, #tpu.memory_space<any>>, %arg7: memref<8x128xf32, #tpu.memory_space<vmem>>, %arg8: memref<8x128xf32, #tpu.memory_space<vmem>>, %arg9: memref<8x!tpu.dma_semaphore, #tpu.memory_space<semaphore_mem>>, %arg10: memref<8x!tpu.dma_semaphore, #tpu.memory_space<semaphore_mem>>) attributes {dimension_semantics = [#tpu.dimension_semantics<arbitrary>], iteration_bounds = array<i64: 1>, scalar_prefetch = 1 : i64, scratch_operands = 3 : i64, tpu.core_type = #tpu.core_type<tc>, window_params = [{pipeline_mode = #tpu.pipeline_mode<synchronous>, transform_indices = @transform_0, window_bounds = array<i64: 8, 128>}, {pipeline_mode = #tpu.pipeline_mode<synchronous>, transform_indices = @transform_1, window_bounds = array<i64: 1, 8>}, {}, {pipeline_mode = #tpu.pipeline_mode<synchronous>, transform_indices = @transform_3, window_bounds = array<i64: 8, 128>}, {}, {pipeline_mode = #tpu.pipeline_mode<synchronous>, transform_indices = @transform_5, window_bounds = array<i64: 8, 128>}]} {
    %c0 = arith.constant 0 : index
    %0 = memref.load %arg1[%c0] : memref<8xi32, #tpu.memory_space<smem>>
    %c0_i32 = arith.constant 0 : i32
    %c0_i32_0 = arith.constant 0 : i32
    %1 = tpu.memref_slice %arg4[%0, %c0_i32_0] : memref<64x128xf32, #tpu.memory_space<any>> -> memref<1x128xf32, #tpu.memory_space<any>>
    %c0_i32_1 = arith.constant 0 : i32
    %c0_i32_2 = arith.constant 0 : i32
    %2 = tpu.memref_slice %arg8[%c0_i32_1, %c0_i32_2] : memref<8x128xf32, #tpu.memory_space<vmem>> -> memref<1x128xf32, #tpu.memory_space<vmem>>
    %3 = tpu.memref_slice %arg9[%c0_i32] : memref<8x!tpu.dma_semaphore, #tpu.memory_space<semaphore_mem>> -> memref<1x!tpu.dma_semaphore, #tpu.memory_space<semaphore_mem>>
    %4 = tpu.memref_squeeze %3 : memref<1x!tpu.dma_semaphore, #tpu.memory_space<semaphore_mem>> -> memref<!tpu.dma_semaphore, #tpu.memory_space<semaphore_mem>>
    tpu.enqueue_dma source(%1 : memref<1x128xf32, #tpu.memory_space<any>>) target(%2 : memref<1x128xf32, #tpu.memory_space<vmem>>) target_semaphore(%4 : memref<!tpu.dma_semaphore, #tpu.memory_space<semaphore_mem>>)
    %c1 = arith.constant 1 : index
    %5 = memref.load %arg1[%c1] : memref<8xi32, #tpu.memory_space<smem>>
    %c1_i32 = arith.constant 1 : i32
    %c0_i32_3 = arith.constant 0 : i32
    %6 = tpu.memref_slice %arg4[%5, %c0_i32_3] : memref<64x128xf32, #tpu.memory_space<any>> -> memref<1x128xf32, #tpu.memory_space<any>>
    %c1_i32_4 = arith.constant 1 : i32
    %c0_i32_5 = arith.constant 0 : i32
    %7 = tpu.memref_slice %arg8[%c1_i32_4, %c0_i32_5] : memref<8x128xf32, #tpu.memory_space<vmem>> -> memref<1x128xf32, #tpu.memory_space<vmem>>
    %8 = tpu.memref_slice %arg9[%c1_i32] : memref<8x!tpu.dma_semaphore, #tpu.memory_space<semaphore_mem>> -> memref<1x!tpu.dma_semaphore, #tpu.memory_space<semaphore_mem>>
    %9 = tpu.memref_squeeze %8 : memref<1x!tpu.dma_semaphore, #tpu.memory_space<semaphore_mem>> -> memref<!tpu.dma_semaphore, #tpu.memory_space<semaphore_mem>>
    tpu.enqueue_dma source(%6 : memref<1x128xf32, #tpu.memory_space<any>>) target(%7 : memref<1x128xf32, #tpu.memory_space<vmem>>) target_semaphore(%9 : memref<!tpu.dma_semaphore, #tpu.memory_space<semaphore_mem>>)
    %c2 = arith.constant 2 : index
    %10 = memref.load %arg1[%c2] : memref<8xi32, #tpu.memory_space<smem>>
    %c2_i32 = arith.constant 2 : i32
    %c0_i32_6 = arith.constant 0 : i32
    %11 = tpu.memref_slice %arg4[%10, %c0_i32_6] : memref<64x128xf32, #tpu.memory_space<any>> -> memref<1x128xf32, #tpu.memory_space<any>>
    %c2_i32_7 = arith.constant 2 : i32
    %c0_i32_8 = arith.constant 0 : i32
    %12 = tpu.memref_slice %arg8[%c2_i32_7, %c0_i32_8] : memref<8x128xf32, #tpu.memory_space<vmem>> -> memref<1x128xf32, #tpu.memory_space<vmem>>
    %13 = tpu.memref_slice %arg9[%c2_i32] : memref<8x!tpu.dma_semaphore, #tpu.memory_space<semaphore_mem>> -> memref<1x!tpu.dma_semaphore, #tpu.memory_space<semaphore_mem>>
    %14 = tpu.memref_squeeze %13 : memref<1x!tpu.dma_semaphore, #tpu.memory_space<semaphore_mem>> -> memref<!tpu.dma_semaphore, #tpu.memory_space<semaphore_mem>>
    tpu.enqueue_dma source(%11 : memref<1x128xf32, #tpu.memory_space<any>>) target(%12 : memref<1x128xf32, #tpu.memory_space<vmem>>) target_semaphore(%14 : memref<!tpu.dma_semaphore, #tpu.memory_space<semaphore_mem>>)
    %c3 = arith.constant 3 : index
    %15 = memref.load %arg1[%c3] : memref<8xi32, #tpu.memory_space<smem>>
    %c3_i32 = arith.constant 3 : i32
    %c0_i32_9 = arith.constant 0 : i32
    %16 = tpu.memref_slice %arg4[%15, %c0_i32_9] : memref<64x128xf32, #tpu.memory_space<any>> -> memref<1x128xf32, #tpu.memory_space<any>>
    %c3_i32_10 = arith.constant 3 : i32
    %c0_i32_11 = arith.constant 0 : i32
    %17 = tpu.memref_slice %arg8[%c3_i32_10, %c0_i32_11] : memref<8x128xf32, #tpu.memory_space<vmem>> -> memref<1x128xf32, #tpu.memory_space<vmem>>
    %18 = tpu.memref_slice %arg9[%c3_i32] : memref<8x!tpu.dma_semaphore, #tpu.memory_space<semaphore_mem>> -> memref<1x!tpu.dma_semaphore, #tpu.memory_space<semaphore_mem>>
    %19 = tpu.memref_squeeze %18 : memref<1x!tpu.dma_semaphore, #tpu.memory_space<semaphore_mem>> -> memref<!tpu.dma_semaphore, #tpu.memory_space<semaphore_mem>>
    tpu.enqueue_dma source(%16 : memref<1x128xf32, #tpu.memory_space<any>>) target(%17 : memref<1x128xf32, #tpu.memory_space<vmem>>) target_semaphore(%19 : memref<!tpu.dma_semaphore, #tpu.memory_space<semaphore_mem>>)
    %c4 = arith.constant 4 : index
    %20 = memref.load %arg1[%c4] : memref<8xi32, #tpu.memory_space<smem>>
    %c4_i32 = arith.constant 4 : i32
    %c0_i32_12 = arith.constant 0 : i32
    %21 = tpu.memref_slice %arg4[%20, %c0_i32_12] : memref<64x128xf32, #tpu.memory_space<any>> -> memref<1x128xf32, #tpu.memory_space<any>>
    %c4_i32_13 = arith.constant 4 : i32
    %c0_i32_14 = arith.constant 0 : i32
    %22 = tpu.memref_slice %arg8[%c4_i32_13, %c0_i32_14] : memref<8x128xf32, #tpu.memory_space<vmem>> -> memref<1x128xf32, #tpu.memory_space<vmem>>
    %23 = tpu.memref_slice %arg9[%c4_i32] : memref<8x!tpu.dma_semaphore, #tpu.memory_space<semaphore_mem>> -> memref<1x!tpu.dma_semaphore, #tpu.memory_space<semaphore_mem>>
    %24 = tpu.memref_squeeze %23 : memref<1x!tpu.dma_semaphore, #tpu.memory_space<semaphore_mem>> -> memref<!tpu.dma_semaphore, #tpu.memory_space<semaphore_mem>>
    tpu.enqueue_dma source(%21 : memref<1x128xf32, #tpu.memory_space<any>>) target(%22 : memref<1x128xf32, #tpu.memory_space<vmem>>) target_semaphore(%24 : memref<!tpu.dma_semaphore, #tpu.memory_space<semaphore_mem>>)
    %c5 = arith.constant 5 : index
    %25 = memref.load %arg1[%c5] : memref<8xi32, #tpu.memory_space<smem>>
    %c5_i32 = arith.constant 5 : i32
    %c0_i32_15 = arith.constant 0 : i32
    %26 = tpu.memref_slice %arg4[%25, %c0_i32_15] : memref<64x128xf32, #tpu.memory_space<any>> -> memref<1x128xf32, #tpu.memory_space<any>>
    %c5_i32_16 = arith.constant 5 : i32
    %c0_i32_17 = arith.constant 0 : i32
    %27 = tpu.memref_slice %arg8[%c5_i32_16, %c0_i32_17] : memref<8x128xf32, #tpu.memory_space<vmem>> -> memref<1x128xf32, #tpu.memory_space<vmem>>
    %28 = tpu.memref_slice %arg9[%c5_i32] : memref<8x!tpu.dma_semaphore, #tpu.memory_space<semaphore_mem>> -> memref<1x!tpu.dma_semaphore, #tpu.memory_space<semaphore_mem>>
    %29 = tpu.memref_squeeze %28 : memref<1x!tpu.dma_semaphore, #tpu.memory_space<semaphore_mem>> -> memref<!tpu.dma_semaphore, #tpu.memory_space<semaphore_mem>>
    tpu.enqueue_dma source(%26 : memref<1x128xf32, #tpu.memory_space<any>>) target(%27 : memref<1x128xf32, #tpu.memory_space<vmem>>) target_semaphore(%29 : memref<!tpu.dma_semaphore, #tpu.memory_space<semaphore_mem>>)
    %c6 = arith.constant 6 : index
    %30 = memref.load %arg1[%c6] : memref<8xi32, #tpu.memory_space<smem>>
    %c6_i32 = arith.constant 6 : i32
    %c0_i32_18 = arith.constant 0 : i32
    %31 = tpu.memref_slice %arg4[%30, %c0_i32_18] : memref<64x128xf32, #tpu.memory_space<any>> -> memref<1x128xf32, #tpu.memory_space<any>>
    %c6_i32_19 = arith.constant 6 : i32
    %c0_i32_20 = arith.constant 0 : i32
    %32 = tpu.memref_slice %arg8[%c6_i32_19, %c0_i32_20] : memref<8x128xf32, #tpu.memory_space<vmem>> -> memref<1x128xf32, #tpu.memory_space<vmem>>
    %33 = tpu.memref_slice %arg9[%c6_i32] : memref<8x!tpu.dma_semaphore, #tpu.memory_space<semaphore_mem>> -> memref<1x!tpu.dma_semaphore, #tpu.memory_space<semaphore_mem>>
    %34 = tpu.memref_squeeze %33 : memref<1x!tpu.dma_semaphore, #tpu.memory_space<semaphore_mem>> -> memref<!tpu.dma_semaphore, #tpu.memory_space<semaphore_mem>>
    tpu.enqueue_dma source(%31 : memref<1x128xf32, #tpu.memory_space<any>>) target(%32 : memref<1x128xf32, #tpu.memory_space<vmem>>) target_semaphore(%34 : memref<!tpu.dma_semaphore, #tpu.memory_space<semaphore_mem>>)
    %c7 = arith.constant 7 : index
    %35 = memref.load %arg1[%c7] : memref<8xi32, #tpu.memory_space<smem>>
    %c7_i32 = arith.constant 7 : i32
    %c0_i32_21 = arith.constant 0 : i32
    %36 = tpu.memref_slice %arg4[%35, %c0_i32_21] : memref<64x128xf32, #tpu.memory_space<any>> -> memref<1x128xf32, #tpu.memory_space<any>>
    %c7_i32_22 = arith.constant 7 : i32
    %c0_i32_23 = arith.constant 0 : i32
    %37 = tpu.memref_slice %arg8[%c7_i32_22, %c0_i32_23] : memref<8x128xf32, #tpu.memory_space<vmem>> -> memref<1x128xf32, #tpu.memory_space<vmem>>
    %38 = tpu.memref_slice %arg9[%c7_i32] : memref<8x!tpu.dma_semaphore, #tpu.memory_space<semaphore_mem>> -> memref<1x!tpu.dma_semaphore, #tpu.memory_space<semaphore_mem>>
    %39 = tpu.memref_squeeze %38 : memref<1x!tpu.dma_semaphore, #tpu.memory_space<semaphore_mem>> -> memref<!tpu.dma_semaphore, #tpu.memory_space<semaphore_mem>>
    tpu.enqueue_dma source(%36 : memref<1x128xf32, #tpu.memory_space<any>>) target(%37 : memref<1x128xf32, #tpu.memory_space<vmem>>) target_semaphore(%39 : memref<!tpu.dma_semaphore, #tpu.memory_space<semaphore_mem>>)
    %40 = tpu.iota {dimensions = array<i32: 0>} : vector<8x8xi32>
    %c0_24 = arith.constant 0 : index
    %c0_25 = arith.constant 0 : index
    %41 = vector.load %arg3[%c0_24, %c0_25] : memref<1x8xi32, #tpu.memory_space<vmem>>, vector<1x8xi32>
    %42 = vector.broadcast %41 : vector<1x8xi32> to vector<8x8xi32>
    %43 = arith.cmpi eq, %40, %42 : vector<8x8xi32>
    %44 = arith.extui %43 : vector<8x8xi1> to vector<8x8xi32>
    %45 = arith.sitofp %44 : vector<8x8xi32> to vector<8x8xf32>
    %c0_i32_26 = arith.constant 0 : i32
    %c0_i32_27 = arith.constant 0 : i32
    %46 = tpu.memref_slice %arg4[%0, %c0_i32_27] : memref<64x128xf32, #tpu.memory_space<any>> -> memref<1x128xf32, #tpu.memory_space<any>>
    %c0_i32_28 = arith.constant 0 : i32
    %c0_i32_29 = arith.constant 0 : i32
    %47 = tpu.memref_slice %arg8[%c0_i32_28, %c0_i32_29] : memref<8x128xf32, #tpu.memory_space<vmem>> -> memref<1x128xf32, #tpu.memory_space<vmem>>
    %48 = tpu.memref_slice %arg9[%c0_i32_26] : memref<8x!tpu.dma_semaphore, #tpu.memory_space<semaphore_mem>> -> memref<1x!tpu.dma_semaphore, #tpu.memory_space<semaphore_mem>>
    %49 = tpu.memref_squeeze %48 : memref<1x!tpu.dma_semaphore, #tpu.memory_space<semaphore_mem>> -> memref<!tpu.dma_semaphore, #tpu.memory_space<semaphore_mem>>
    tpu.wait_dma2 semaphore(%49 : memref<!tpu.dma_semaphore, #tpu.memory_space<semaphore_mem>>) src(%46 : memref<1x128xf32, #tpu.memory_space<any>>) dst(%47 : memref<1x128xf32, #tpu.memory_space<vmem>>)
    %c1_i32_30 = arith.constant 1 : i32
    %c0_i32_31 = arith.constant 0 : i32
    %50 = tpu.memref_slice %arg4[%5, %c0_i32_31] : memref<64x128xf32, #tpu.memory_space<any>> -> memref<1x128xf32, #tpu.memory_space<any>>
    %c1_i32_32 = arith.constant 1 : i32
    %c0_i32_33 = arith.constant 0 : i32
    %51 = tpu.memref_slice %arg8[%c1_i32_32, %c0_i32_33] : memref<8x128xf32, #tpu.memory_space<vmem>> -> memref<1x128xf32, #tpu.memory_space<vmem>>
    %52 = tpu.memref_slice %arg9[%c1_i32_30] : memref<8x!tpu.dma_semaphore, #tpu.memory_space<semaphore_mem>> -> memref<1x!tpu.dma_semaphore, #tpu.memory_space<semaphore_mem>>
    %53 = tpu.memref_squeeze %52 : memref<1x!tpu.dma_semaphore, #tpu.memory_space<semaphore_mem>> -> memref<!tpu.dma_semaphore, #tpu.memory_space<semaphore_mem>>
    tpu.wait_dma2 semaphore(%53 : memref<!tpu.dma_semaphore, #tpu.memory_space<semaphore_mem>>) src(%50 : memref<1x128xf32, #tpu.memory_space<any>>) dst(%51 : memref<1x128xf32, #tpu.memory_space<vmem>>)
    %c2_i32_34 = arith.constant 2 : i32
    %c0_i32_35 = arith.constant 0 : i32
    %54 = tpu.memref_slice %arg4[%10, %c0_i32_35] : memref<64x128xf32, #tpu.memory_space<any>> -> memref<1x128xf32, #tpu.memory_space<any>>
    %c2_i32_36 = arith.constant 2 : i32
    %c0_i32_37 = arith.constant 0 : i32
    %55 = tpu.memref_slice %arg8[%c2_i32_36, %c0_i32_37] : memref<8x128xf32, #tpu.memory_space<vmem>> -> memref<1x128xf32, #tpu.memory_space<vmem>>
    %56 = tpu.memref_slice %arg9[%c2_i32_34] : memref<8x!tpu.dma_semaphore, #tpu.memory_space<semaphore_mem>> -> memref<1x!tpu.dma_semaphore, #tpu.memory_space<semaphore_mem>>
    %57 = tpu.memref_squeeze %56 : memref<1x!tpu.dma_semaphore, #tpu.memory_space<semaphore_mem>> -> memref<!tpu.dma_semaphore, #tpu.memory_space<semaphore_mem>>
    tpu.wait_dma2 semaphore(%57 : memref<!tpu.dma_semaphore, #tpu.memory_space<semaphore_mem>>) src(%54 : memref<1x128xf32, #tpu.memory_space<any>>) dst(%55 : memref<1x128xf32, #tpu.memory_space<vmem>>)
    %c3_i32_38 = arith.constant 3 : i32
    %c0_i32_39 = arith.constant 0 : i32
    %58 = tpu.memref_slice %arg4[%15, %c0_i32_39] : memref<64x128xf32, #tpu.memory_space<any>> -> memref<1x128xf32, #tpu.memory_space<any>>
    %c3_i32_40 = arith.constant 3 : i32
    %c0_i32_41 = arith.constant 0 : i32
    %59 = tpu.memref_slice %arg8[%c3_i32_40, %c0_i32_41] : memref<8x128xf32, #tpu.memory_space<vmem>> -> memref<1x128xf32, #tpu.memory_space<vmem>>
    %60 = tpu.memref_slice %arg9[%c3_i32_38] : memref<8x!tpu.dma_semaphore, #tpu.memory_space<semaphore_mem>> -> memref<1x!tpu.dma_semaphore, #tpu.memory_space<semaphore_mem>>
    %61 = tpu.memref_squeeze %60 : memref<1x!tpu.dma_semaphore, #tpu.memory_space<semaphore_mem>> -> memref<!tpu.dma_semaphore, #tpu.memory_space<semaphore_mem>>
    tpu.wait_dma2 semaphore(%61 : memref<!tpu.dma_semaphore, #tpu.memory_space<semaphore_mem>>) src(%58 : memref<1x128xf32, #tpu.memory_space<any>>) dst(%59 : memref<1x128xf32, #tpu.memory_space<vmem>>)
    %c4_i32_42 = arith.constant 4 : i32
    %c0_i32_43 = arith.constant 0 : i32
    %62 = tpu.memref_slice %arg4[%20, %c0_i32_43] : memref<64x128xf32, #tpu.memory_space<any>> -> memref<1x128xf32, #tpu.memory_space<any>>
    %c4_i32_44 = arith.constant 4 : i32
    %c0_i32_45 = arith.constant 0 : i32
    %63 = tpu.memref_slice %arg8[%c4_i32_44, %c0_i32_45] : memref<8x128xf32, #tpu.memory_space<vmem>> -> memref<1x128xf32, #tpu.memory_space<vmem>>
    %64 = tpu.memref_slice %arg9[%c4_i32_42] : memref<8x!tpu.dma_semaphore, #tpu.memory_space<semaphore_mem>> -> memref<1x!tpu.dma_semaphore, #tpu.memory_space<semaphore_mem>>
    %65 = tpu.memref_squeeze %64 : memref<1x!tpu.dma_semaphore, #tpu.memory_space<semaphore_mem>> -> memref<!tpu.dma_semaphore, #tpu.memory_space<semaphore_mem>>
    tpu.wait_dma2 semaphore(%65 : memref<!tpu.dma_semaphore, #tpu.memory_space<semaphore_mem>>) src(%62 : memref<1x128xf32, #tpu.memory_space<any>>) dst(%63 : memref<1x128xf32, #tpu.memory_space<vmem>>)
    %c5_i32_46 = arith.constant 5 : i32
    %c0_i32_47 = arith.constant 0 : i32
    %66 = tpu.memref_slice %arg4[%25, %c0_i32_47] : memref<64x128xf32, #tpu.memory_space<any>> -> memref<1x128xf32, #tpu.memory_space<any>>
    %c5_i32_48 = arith.constant 5 : i32
    %c0_i32_49 = arith.constant 0 : i32
    %67 = tpu.memref_slice %arg8[%c5_i32_48, %c0_i32_49] : memref<8x128xf32, #tpu.memory_space<vmem>> -> memref<1x128xf32, #tpu.memory_space<vmem>>
    %68 = tpu.memref_slice %arg9[%c5_i32_46] : memref<8x!tpu.dma_semaphore, #tpu.memory_space<semaphore_mem>> -> memref<1x!tpu.dma_semaphore, #tpu.memory_space<semaphore_mem>>
    %69 = tpu.memref_squeeze %68 : memref<1x!tpu.dma_semaphore, #tpu.memory_space<semaphore_mem>> -> memref<!tpu.dma_semaphore, #tpu.memory_space<semaphore_mem>>
    tpu.wait_dma2 semaphore(%69 : memref<!tpu.dma_semaphore, #tpu.memory_space<semaphore_mem>>) src(%66 : memref<1x128xf32, #tpu.memory_space<any>>) dst(%67 : memref<1x128xf32, #tpu.memory_space<vmem>>)
    %c6_i32_50 = arith.constant 6 : i32
    %c0_i32_51 = arith.constant 0 : i32
    %70 = tpu.memref_slice %arg4[%30, %c0_i32_51] : memref<64x128xf32, #tpu.memory_space<any>> -> memref<1x128xf32, #tpu.memory_space<any>>
    %c6_i32_52 = arith.constant 6 : i32
    %c0_i32_53 = arith.constant 0 : i32
    %71 = tpu.memref_slice %arg8[%c6_i32_52, %c0_i32_53] : memref<8x128xf32, #tpu.memory_space<vmem>> -> memref<1x128xf32, #tpu.memory_space<vmem>>
    %72 = tpu.memref_slice %arg9[%c6_i32_50] : memref<8x!tpu.dma_semaphore, #tpu.memory_space<semaphore_mem>> -> memref<1x!tpu.dma_semaphore, #tpu.memory_space<semaphore_mem>>
    %73 = tpu.memref_squeeze %72 : memref<1x!tpu.dma_semaphore, #tpu.memory_space<semaphore_mem>> -> memref<!tpu.dma_semaphore, #tpu.memory_space<semaphore_mem>>
    tpu.wait_dma2 semaphore(%73 : memref<!tpu.dma_semaphore, #tpu.memory_space<semaphore_mem>>) src(%70 : memref<1x128xf32, #tpu.memory_space<any>>) dst(%71 : memref<1x128xf32, #tpu.memory_space<vmem>>)
    %c7_i32_54 = arith.constant 7 : i32
    %c0_i32_55 = arith.constant 0 : i32
    %74 = tpu.memref_slice %arg4[%35, %c0_i32_55] : memref<64x128xf32, #tpu.memory_space<any>> -> memref<1x128xf32, #tpu.memory_space<any>>
    %c7_i32_56 = arith.constant 7 : i32
    %c0_i32_57 = arith.constant 0 : i32
    %75 = tpu.memref_slice %arg8[%c7_i32_56, %c0_i32_57] : memref<8x128xf32, #tpu.memory_space<vmem>> -> memref<1x128xf32, #tpu.memory_space<vmem>>
    %76 = tpu.memref_slice %arg9[%c7_i32_54] : memref<8x!tpu.dma_semaphore, #tpu.memory_space<semaphore_mem>> -> memref<1x!tpu.dma_semaphore, #tpu.memory_space<semaphore_mem>>
    %77 = tpu.memref_squeeze %76 : memref<1x!tpu.dma_semaphore, #tpu.memory_space<semaphore_mem>> -> memref<!tpu.dma_semaphore, #tpu.memory_space<semaphore_mem>>
    tpu.wait_dma2 semaphore(%77 : memref<!tpu.dma_semaphore, #tpu.memory_space<semaphore_mem>>) src(%74 : memref<1x128xf32, #tpu.memory_space<any>>) dst(%75 : memref<1x128xf32, #tpu.memory_space<vmem>>)
    %c0_58 = arith.constant 0 : index
    %c0_59 = arith.constant 0 : index
    %78 = vector.load %arg8[%c0_58, %c0_59] : memref<8x128xf32, #tpu.memory_space<vmem>>, vector<8x128xf32>
    %cst = arith.constant 1.000000e-01 : f32
    %79 = vector.broadcast %cst : f32 to vector<8x128xf32>
    %80 = arith.mulf %78, %79 : vector<8x128xf32>
    %c0_60 = arith.constant 0 : index
    %c0_61 = arith.constant 0 : index
    %81 = vector.load %arg2[%c0_60, %c0_61] : memref<8x128xf32, #tpu.memory_space<vmem>>, vector<8x128xf32>
    %cst_62 = arith.constant 0.899999976 : f32
    %82 = vector.broadcast %cst_62 : f32 to vector<8x128xf32>
    %83 = arith.mulf %81, %82 : vector<8x128xf32>
    %84 = arith.addf %80, %83 : vector<8x128xf32>
    %85 = arith.mulf %84, %84 : vector<8x128xf32>
    %cst_63 = arith.constant dense<0.000000e+00> : vector<8xf32>
    %86 = vector.multi_reduction <add>, %85, %cst_63 [1] : vector<8x128xf32> to vector<8xf32>
    %87 = vector.shape_cast %86 : vector<8xf32> to vector<8x1xf32>
    %88 = math.rsqrt %87 : vector<8x1xf32>
    %89 = vector.broadcast %88 : vector<8x1xf32> to vector<8x128xf32>
    %90 = arith.mulf %84, %89 : vector<8x128xf32>
    %c0_64 = arith.constant 0 : index
    %c0_65 = arith.constant 0 : index
    %91 = vector.load %arg8[%c0_64, %c0_65] : memref<8x128xf32, #tpu.memory_space<vmem>>, vector<8x128xf32>
    tpu.vector_store %arg8[%c0_64, %c0_65], %90 {strides = array<i32>} : memref<8x128xf32, #tpu.memory_space<vmem>>, vector<8x128xf32>,
    %c0_66 = arith.constant 0 : index
    %92 = memref.load %arg1[%c0_66] : memref<8xi32, #tpu.memory_space<smem>>
    %c0_i32_67 = arith.constant 0 : i32
    %c0_i32_68 = arith.constant 0 : i32
    %c0_i32_69 = arith.constant 0 : i32
    %93 = tpu.memref_slice %arg8[%c0_i32_68, %c0_i32_69] : memref<8x128xf32, #tpu.memory_space<vmem>> -> memref<1x128xf32, #tpu.memory_space<vmem>>
    %c0_i32_70 = arith.constant 0 : i32
    %94 = tpu.memref_slice %arg6[%92, %c0_i32_70] : memref<64x128xf32, #tpu.memory_space<any>> -> memref<1x128xf32, #tpu.memory_space<any>>
    %95 = tpu.memref_slice %arg10[%c0_i32_67] : memref<8x!tpu.dma_semaphore, #tpu.memory_space<semaphore_mem>> -> memref<1x!tpu.dma_semaphore, #tpu.memory_space<semaphore_mem>>
    %96 = tpu.memref_squeeze %95 : memref<1x!tpu.dma_semaphore, #tpu.memory_space<semaphore_mem>> -> memref<!tpu.dma_semaphore, #tpu.memory_space<semaphore_mem>>
    tpu.enqueue_dma source(%93 : memref<1x128xf32, #tpu.memory_space<vmem>>) target(%94 : memref<1x128xf32, #tpu.memory_space<any>>) target_semaphore(%96 : memref<!tpu.dma_semaphore, #tpu.memory_space<semaphore_mem>>)
    %c1_71 = arith.constant 1 : index
    %97 = memref.load %arg1[%c1_71] : memref<8xi32, #tpu.memory_space<smem>>
    %c1_i32_72 = arith.constant 1 : i32
    %c1_i32_73 = arith.constant 1 : i32
    %c0_i32_74 = arith.constant 0 : i32
    %98 = tpu.memref_slice %arg8[%c1_i32_73, %c0_i32_74] : memref<8x128xf32, #tpu.memory_space<vmem>> -> memref<1x128xf32, #tpu.memory_space<vmem>>
    %c0_i32_75 = arith.constant 0 : i32
    %99 = tpu.memref_slice %arg6[%97, %c0_i32_75] : memref<64x128xf32, #tpu.memory_space<any>> -> memref<1x128xf32, #tpu.memory_space<any>>
    %100 = tpu.memref_slice %arg10[%c1_i32_72] : memref<8x!tpu.dma_semaphore, #tpu.memory_space<semaphore_mem>> -> memref<1x!tpu.dma_semaphore, #tpu.memory_space<semaphore_mem>>
    %101 = tpu.memref_squeeze %100 : memref<1x!tpu.dma_semaphore, #tpu.memory_space<semaphore_mem>> -> memref<!tpu.dma_semaphore, #tpu.memory_space<semaphore_mem>>
    tpu.enqueue_dma source(%98 : memref<1x128xf32, #tpu.memory_space<vmem>>) target(%99 : memref<1x128xf32, #tpu.memory_space<any>>) target_semaphore(%101 : memref<!tpu.dma_semaphore, #tpu.memory_space<semaphore_mem>>)
    %c2_76 = arith.constant 2 : index
    %102 = memref.load %arg1[%c2_76] : memref<8xi32, #tpu.memory_space<smem>>
    %c2_i32_77 = arith.constant 2 : i32
    %c2_i32_78 = arith.constant 2 : i32
    %c0_i32_79 = arith.constant 0 : i32
    %103 = tpu.memref_slice %arg8[%c2_i32_78, %c0_i32_79] : memref<8x128xf32, #tpu.memory_space<vmem>> -> memref<1x128xf32, #tpu.memory_space<vmem>>
    %c0_i32_80 = arith.constant 0 : i32
    %104 = tpu.memref_slice %arg6[%102, %c0_i32_80] : memref<64x128xf32, #tpu.memory_space<any>> -> memref<1x128xf32, #tpu.memory_space<any>>
    %105 = tpu.memref_slice %arg10[%c2_i32_77] : memref<8x!tpu.dma_semaphore, #tpu.memory_space<semaphore_mem>> -> memref<1x!tpu.dma_semaphore, #tpu.memory_space<semaphore_mem>>
    %106 = tpu.memref_squeeze %105 : memref<1x!tpu.dma_semaphore, #tpu.memory_space<semaphore_mem>> -> memref<!tpu.dma_semaphore, #tpu.memory_space<semaphore_mem>>
    tpu.enqueue_dma source(%103 : memref<1x128xf32, #tpu.memory_space<vmem>>) target(%104 : memref<1x128xf32, #tpu.memory_space<any>>) target_semaphore(%106 : memref<!tpu.dma_semaphore, #tpu.memory_space<semaphore_mem>>)
    %c3_81 = arith.constant 3 : index
    %107 = memref.load %arg1[%c3_81] : memref<8xi32, #tpu.memory_space<smem>>
    %c3_i32_82 = arith.constant 3 : i32
    %c3_i32_83 = arith.constant 3 : i32
    %c0_i32_84 = arith.constant 0 : i32
    %108 = tpu.memref_slice %arg8[%c3_i32_83, %c0_i32_84] : memref<8x128xf32, #tpu.memory_space<vmem>> -> memref<1x128xf32, #tpu.memory_space<vmem>>
    %c0_i32_85 = arith.constant 0 : i32
    %109 = tpu.memref_slice %arg6[%107, %c0_i32_85] : memref<64x128xf32, #tpu.memory_space<any>> -> memref<1x128xf32, #tpu.memory_space<any>>
    %110 = tpu.memref_slice %arg10[%c3_i32_82] : memref<8x!tpu.dma_semaphore, #tpu.memory_space<semaphore_mem>> -> memref<1x!tpu.dma_semaphore, #tpu.memory_space<semaphore_mem>>
    %111 = tpu.memref_squeeze %110 : memref<1x!tpu.dma_semaphore, #tpu.memory_space<semaphore_mem>> -> memref<!tpu.dma_semaphore, #tpu.memory_space<semaphore_mem>>
    tpu.enqueue_dma source(%108 : memref<1x128xf32, #tpu.memory_space<vmem>>) target(%109 : memref<1x128xf32, #tpu.memory_space<any>>) target_semaphore(%111 : memref<!tpu.dma_semaphore, #tpu.memory_space<semaphore_mem>>)
    %c4_86 = arith.constant 4 : index
    %112 = memref.load %arg1[%c4_86] : memref<8xi32, #tpu.memory_space<smem>>
    %c4_i32_87 = arith.constant 4 : i32
    %c4_i32_88 = arith.constant 4 : i32
    %c0_i32_89 = arith.constant 0 : i32
    %113 = tpu.memref_slice %arg8[%c4_i32_88, %c0_i32_89] : memref<8x128xf32, #tpu.memory_space<vmem>> -> memref<1x128xf32, #tpu.memory_space<vmem>>
    %c0_i32_90 = arith.constant 0 : i32
    %114 = tpu.memref_slice %arg6[%112, %c0_i32_90] : memref<64x128xf32, #tpu.memory_space<any>> -> memref<1x128xf32, #tpu.memory_space<any>>
    %115 = tpu.memref_slice %arg10[%c4_i32_87] : memref<8x!tpu.dma_semaphore, #tpu.memory_space<semaphore_mem>> -> memref<1x!tpu.dma_semaphore, #tpu.memory_space<semaphore_mem>>
    %116 = tpu.memref_squeeze %115 : memref<1x!tpu.dma_semaphore, #tpu.memory_space<semaphore_mem>> -> memref<!tpu.dma_semaphore, #tpu.memory_space<semaphore_mem>>
    tpu.enqueue_dma source(%113 : memref<1x128xf32, #tpu.memory_space<vmem>>) target(%114 : memref<1x128xf32, #tpu.memory_space<any>>) target_semaphore(%116 : memref<!tpu.dma_semaphore, #tpu.memory_space<semaphore_mem>>)
    %c5_91 = arith.constant 5 : index
    %117 = memref.load %arg1[%c5_91] : memref<8xi32, #tpu.memory_space<smem>>
    %c5_i32_92 = arith.constant 5 : i32
    %c5_i32_93 = arith.constant 5 : i32
    %c0_i32_94 = arith.constant 0 : i32
    %118 = tpu.memref_slice %arg8[%c5_i32_93, %c0_i32_94] : memref<8x128xf32, #tpu.memory_space<vmem>> -> memref<1x128xf32, #tpu.memory_space<vmem>>
    %c0_i32_95 = arith.constant 0 : i32
    %119 = tpu.memref_slice %arg6[%117, %c0_i32_95] : memref<64x128xf32, #tpu.memory_space<any>> -> memref<1x128xf32, #tpu.memory_space<any>>
    %120 = tpu.memref_slice %arg10[%c5_i32_92] : memref<8x!tpu.dma_semaphore, #tpu.memory_space<semaphore_mem>> -> memref<1x!tpu.dma_semaphore, #tpu.memory_space<semaphore_mem>>
    %121 = tpu.memref_squeeze %120 : memref<1x!tpu.dma_semaphore, #tpu.memory_space<semaphore_mem>> -> memref<!tpu.dma_semaphore, #tpu.memory_space<semaphore_mem>>
    tpu.enqueue_dma source(%118 : memref<1x128xf32, #tpu.memory_space<vmem>>) target(%119 : memref<1x128xf32, #tpu.memory_space<any>>) target_semaphore(%121 : memref<!tpu.dma_semaphore, #tpu.memory_space<semaphore_mem>>)
    %c6_96 = arith.constant 6 : index
    %122 = memref.load %arg1[%c6_96] : memref<8xi32, #tpu.memory_space<smem>>
    %c6_i32_97 = arith.constant 6 : i32
    %c6_i32_98 = arith.constant 6 : i32
    %c0_i32_99 = arith.constant 0 : i32
    %123 = tpu.memref_slice %arg8[%c6_i32_98, %c0_i32_99] : memref<8x128xf32, #tpu.memory_space<vmem>> -> memref<1x128xf32, #tpu.memory_space<vmem>>
    %c0_i32_100 = arith.constant 0 : i32
    %124 = tpu.memref_slice %arg6[%122, %c0_i32_100] : memref<64x128xf32, #tpu.memory_space<any>> -> memref<1x128xf32, #tpu.memory_space<any>>
    %125 = tpu.memref_slice %arg10[%c6_i32_97] : memref<8x!tpu.dma_semaphore, #tpu.memory_space<semaphore_mem>> -> memref<1x!tpu.dma_semaphore, #tpu.memory_space<semaphore_mem>>
    %126 = tpu.memref_squeeze %125 : memref<1x!tpu.dma_semaphore, #tpu.memory_space<semaphore_mem>> -> memref<!tpu.dma_semaphore, #tpu.memory_space<semaphore_mem>>
    tpu.enqueue_dma source(%123 : memref<1x128xf32, #tpu.memory_space<vmem>>) target(%124 : memref<1x128xf32, #tpu.memory_space<any>>) target_semaphore(%126 : memref<!tpu.dma_semaphore, #tpu.memory_space<semaphore_mem>>)
    %c7_101 = arith.constant 7 : index
    %127 = memref.load %arg1[%c7_101] : memref<8xi32, #tpu.memory_space<smem>>
    %c7_i32_102 = arith.constant 7 : i32
    %c7_i32_103 = arith.constant 7 : i32
    %c0_i32_104 = arith.constant 0 : i32
    %128 = tpu.memref_slice %arg8[%c7_i32_103, %c0_i32_104] : memref<8x128xf32, #tpu.memory_space<vmem>> -> memref<1x128xf32, #tpu.memory_space<vmem>>
    %c0_i32_105 = arith.constant 0 : i32
    %129 = tpu.memref_slice %arg6[%127, %c0_i32_105] : memref<64x128xf32, #tpu.memory_space<any>> -> memref<1x128xf32, #tpu.memory_space<any>>
    %130 = tpu.memref_slice %arg10[%c7_i32_102] : memref<8x!tpu.dma_semaphore, #tpu.memory_space<semaphore_mem>> -> memref<1x!tpu.dma_semaphore, #tpu.memory_space<semaphore_mem>>
    %131 = tpu.memref_squeeze %130 : memref<1x!tpu.dma_semaphore, #tpu.memory_space<semaphore_mem>> -> memref<!tpu.dma_semaphore, #tpu.memory_space<semaphore_mem>>
    tpu.enqueue_dma source(%128 : memref<1x128xf32, #tpu.memory_space<vmem>>) target(%129 : memref<1x128xf32, #tpu.memory_space<any>>) target_semaphore(%131 : memref<!tpu.dma_semaphore, #tpu.memory_space<semaphore_mem>>)
    %c0_106 = arith.constant 0 : index
    %c0_107 = arith.constant 0 : index
    %132 = vector.load %arg5[%c0_106, %c0_107] : memref<8x128xf32, #tpu.memory_space<vmem>>, vector<8x128xf32>
    %cst_108 = arith.constant dense<0.000000e+00> : vector<8x128xf32>
    %133 = tpu.matmul %45, %90, %cst_108 {dimension_numbers = #tpu.dot_dimension_numbers<[1], [0], [0], [1], [0, 0, 1, 1], [], []>} : vector<8x8xf32>, vector<8x128xf32>, vector<8x128xf32> -> vector<8x128xf32>
    %134 = arith.addf %132, %133 : vector<8x128xf32>
    %c0_109 = arith.constant 0 : index
    %c0_110 = arith.constant 0 : index
    %135 = vector.load %arg7[%c0_109, %c0_110] : memref<8x128xf32, #tpu.memory_space<vmem>>, vector<8x128xf32>
    tpu.vector_store %arg7[%c0_109, %c0_110], %134 {strides = array<i32>} : memref<8x128xf32, #tpu.memory_space<vmem>>, vector<8x128xf32>,
    %c0_i32_111 = arith.constant 0 : i32
    %c0_i32_112 = arith.constant 0 : i32
    %c0_i32_113 = arith.constant 0 : i32
    %136 = tpu.memref_slice %arg8[%c0_i32_112, %c0_i32_113] : memref<8x128xf32, #tpu.memory_space<vmem>> -> memref<1x128xf32, #tpu.memory_space<vmem>>
    %c0_i32_114 = arith.constant 0 : i32
    %137 = tpu.memref_slice %arg6[%92, %c0_i32_114] : memref<64x128xf32, #tpu.memory_space<any>> -> memref<1x128xf32, #tpu.memory_space<any>>
    %138 = tpu.memref_slice %arg10[%c0_i32_111] : memref<8x!tpu.dma_semaphore, #tpu.memory_space<semaphore_mem>> -> memref<1x!tpu.dma_semaphore, #tpu.memory_space<semaphore_mem>>
    %139 = tpu.memref_squeeze %138 : memref<1x!tpu.dma_semaphore, #tpu.memory_space<semaphore_mem>> -> memref<!tpu.dma_semaphore, #tpu.memory_space<semaphore_mem>>
    tpu.wait_dma2 semaphore(%139 : memref<!tpu.dma_semaphore, #tpu.memory_space<semaphore_mem>>) src(%136 : memref<1x128xf32, #tpu.memory_space<vmem>>) dst(%137 : memref<1x128xf32, #tpu.memory_space<any>>)
    %c1_i32_115 = arith.constant 1 : i32
    %c1_i32_116 = arith.constant 1 : i32
    %c0_i32_117 = arith.constant 0 : i32
    %140 = tpu.memref_slice %arg8[%c1_i32_116, %c0_i32_117] : memref<8x128xf32, #tpu.memory_space<vmem>> -> memref<1x128xf32, #tpu.memory_space<vmem>>
    %c0_i32_118 = arith.constant 0 : i32
    %141 = tpu.memref_slice %arg6[%97, %c0_i32_118] : memref<64x128xf32, #tpu.memory_space<any>> -> memref<1x128xf32, #tpu.memory_space<any>>
    %142 = tpu.memref_slice %arg10[%c1_i32_115] : memref<8x!tpu.dma_semaphore, #tpu.memory_space<semaphore_mem>> -> memref<1x!tpu.dma_semaphore, #tpu.memory_space<semaphore_mem>>
    %143 = tpu.memref_squeeze %142 : memref<1x!tpu.dma_semaphore, #tpu.memory_space<semaphore_mem>> -> memref<!tpu.dma_semaphore, #tpu.memory_space<semaphore_mem>>
    tpu.wait_dma2 semaphore(%143 : memref<!tpu.dma_semaphore, #tpu.memory_space<semaphore_mem>>) src(%140 : memref<1x128xf32, #tpu.memory_space<vmem>>) dst(%141 : memref<1x128xf32, #tpu.memory_space<any>>)
    %c2_i32_119 = arith.constant 2 : i32
    %c2_i32_120 = arith.constant 2 : i32
    %c0_i32_121 = arith.constant 0 : i32
    %144 = tpu.memref_slice %arg8[%c2_i32_120, %c0_i32_121] : memref<8x128xf32, #tpu.memory_space<vmem>> -> memref<1x128xf32, #tpu.memory_space<vmem>>
    %c0_i32_122 = arith.constant 0 : i32
    %145 = tpu.memref_slice %arg6[%102, %c0_i32_122] : memref<64x128xf32, #tpu.memory_space<any>> -> memref<1x128xf32, #tpu.memory_space<any>>
    %146 = tpu.memref_slice %arg10[%c2_i32_119] : memref<8x!tpu.dma_semaphore, #tpu.memory_space<semaphore_mem>> -> memref<1x!tpu.dma_semaphore, #tpu.memory_space<semaphore_mem>>
    %147 = tpu.memref_squeeze %146 : memref<1x!tpu.dma_semaphore, #tpu.memory_space<semaphore_mem>> -> memref<!tpu.dma_semaphore, #tpu.memory_space<semaphore_mem>>
    tpu.wait_dma2 semaphore(%147 : memref<!tpu.dma_semaphore, #tpu.memory_space<semaphore_mem>>) src(%144 : memref<1x128xf32, #tpu.memory_space<vmem>>) dst(%145 : memref<1x128xf32, #tpu.memory_space<any>>)
    %c3_i32_123 = arith.constant 3 : i32
    %c3_i32_124 = arith.constant 3 : i32
    %c0_i32_125 = arith.constant 0 : i32
    %148 = tpu.memref_slice %arg8[%c3_i32_124, %c0_i32_125] : memref<8x128xf32, #tpu.memory_space<vmem>> -> memref<1x128xf32, #tpu.memory_space<vmem>>
    %c0_i32_126 = arith.constant 0 : i32
    %149 = tpu.memref_slice %arg6[%107, %c0_i32_126] : memref<64x128xf32, #tpu.memory_space<any>> -> memref<1x128xf32, #tpu.memory_space<any>>
    %150 = tpu.memref_slice %arg10[%c3_i32_123] : memref<8x!tpu.dma_semaphore, #tpu.memory_space<semaphore_mem>> -> memref<1x!tpu.dma_semaphore, #tpu.memory_space<semaphore_mem>>
    %151 = tpu.memref_squeeze %150 : memref<1x!tpu.dma_semaphore, #tpu.memory_space<semaphore_mem>> -> memref<!tpu.dma_semaphore, #tpu.memory_space<semaphore_mem>>
    tpu.wait_dma2 semaphore(%151 : memref<!tpu.dma_semaphore, #tpu.memory_space<semaphore_mem>>) src(%148 : memref<1x128xf32, #tpu.memory_space<vmem>>) dst(%149 : memref<1x128xf32, #tpu.memory_space<any>>)
    %c4_i32_127 = arith.constant 4 : i32
    %c4_i32_128 = arith.constant 4 : i32
    %c0_i32_129 = arith.constant 0 : i32
    %152 = tpu.memref_slice %arg8[%c4_i32_128, %c0_i32_129] : memref<8x128xf32, #tpu.memory_space<vmem>> -> memref<1x128xf32, #tpu.memory_space<vmem>>
    %c0_i32_130 = arith.constant 0 : i32
    %153 = tpu.memref_slice %arg6[%112, %c0_i32_130] : memref<64x128xf32, #tpu.memory_space<any>> -> memref<1x128xf32, #tpu.memory_space<any>>
    %154 = tpu.memref_slice %arg10[%c4_i32_127] : memref<8x!tpu.dma_semaphore, #tpu.memory_space<semaphore_mem>> -> memref<1x!tpu.dma_semaphore, #tpu.memory_space<semaphore_mem>>
    %155 = tpu.memref_squeeze %154 : memref<1x!tpu.dma_semaphore, #tpu.memory_space<semaphore_mem>> -> memref<!tpu.dma_semaphore, #tpu.memory_space<semaphore_mem>>
    tpu.wait_dma2 semaphore(%155 : memref<!tpu.dma_semaphore, #tpu.memory_space<semaphore_mem>>) src(%152 : memref<1x128xf32, #tpu.memory_space<vmem>>) dst(%153 : memref<1x128xf32, #tpu.memory_space<any>>)
    %c5_i32_131 = arith.constant 5 : i32
    %c5_i32_132 = arith.constant 5 : i32
    %c0_i32_133 = arith.constant 0 : i32
    %156 = tpu.memref_slice %arg8[%c5_i32_132, %c0_i32_133] : memref<8x128xf32, #tpu.memory_space<vmem>> -> memref<1x128xf32, #tpu.memory_space<vmem>>
    %c0_i32_134 = arith.constant 0 : i32
    %157 = tpu.memref_slice %arg6[%117, %c0_i32_134] : memref<64x128xf32, #tpu.memory_space<any>> -> memref<1x128xf32, #tpu.memory_space<any>>
    %158 = tpu.memref_slice %arg10[%c5_i32_131] : memref<8x!tpu.dma_semaphore, #tpu.memory_space<semaphore_mem>> -> memref<1x!tpu.dma_semaphore, #tpu.memory_space<semaphore_mem>>
    %159 = tpu.memref_squeeze %158 : memref<1x!tpu.dma_semaphore, #tpu.memory_space<semaphore_mem>> -> memref<!tpu.dma_semaphore, #tpu.memory_space<semaphore_mem>>
    tpu.wait_dma2 semaphore(%159 : memref<!tpu.dma_semaphore, #tpu.memory_space<semaphore_mem>>) src(%156 : memref<1x128xf32, #tpu.memory_space<vmem>>) dst(%157 : memref<1x128xf32, #tpu.memory_space<any>>)
    %c6_i32_135 = arith.constant 6 : i32
    %c6_i32_136 = arith.constant 6 : i32
    %c0_i32_137 = arith.constant 0 : i32
    %160 = tpu.memref_slice %arg8[%c6_i32_136, %c0_i32_137] : memref<8x128xf32, #tpu.memory_space<vmem>> -> memref<1x128xf32, #tpu.memory_space<vmem>>
    %c0_i32_138 = arith.constant 0 : i32
    %161 = tpu.memref_slice %arg6[%122, %c0_i32_138] : memref<64x128xf32, #tpu.memory_space<any>> -> memref<1x128xf32, #tpu.memory_space<any>>
    %162 = tpu.memref_slice %arg10[%c6_i32_135] : memref<8x!tpu.dma_semaphore, #tpu.memory_space<semaphore_mem>> -> memref<1x!tpu.dma_semaphore, #tpu.memory_space<semaphore_mem>>
    %163 = tpu.memref_squeeze %162 : memref<1x!tpu.dma_semaphore, #tpu.memory_space<semaphore_mem>> -> memref<!tpu.dma_semaphore, #tpu.memory_space<semaphore_mem>>
    tpu.wait_dma2 semaphore(%163 : memref<!tpu.dma_semaphore, #tpu.memory_space<semaphore_mem>>) src(%160 : memref<1x128xf32, #tpu.memory_space<vmem>>) dst(%161 : memref<1x128xf32, #tpu.memory_space<any>>)
    %c7_i32_139 = arith.constant 7 : i32
    %c7_i32_140 = arith.constant 7 : i32
    %c0_i32_141 = arith.constant 0 : i32
    %164 = tpu.memref_slice %arg8[%c7_i32_140, %c0_i32_141] : memref<8x128xf32, #tpu.memory_space<vmem>> -> memref<1x128xf32, #tpu.memory_space<vmem>>
    %c0_i32_142 = arith.constant 0 : i32
    %165 = tpu.memref_slice %arg6[%127, %c0_i32_142] : memref<64x128xf32, #tpu.memory_space<any>> -> memref<1x128xf32, #tpu.memory_space<any>>
    %166 = tpu.memref_slice %arg10[%c7_i32_139] : memref<8x!tpu.dma_semaphore, #tpu.memory_space<semaphore_mem>> -> memref<1x!tpu.dma_semaphore, #tpu.memory_space<semaphore_mem>>
    %167 = tpu.memref_squeeze %166 : memref<1x!tpu.dma_semaphore, #tpu.memory_space<semaphore_mem>> -> memref<!tpu.dma_semaphore, #tpu.memory_space<semaphore_mem>>
    tpu.wait_dma2 semaphore(%167 : memref<!tpu.dma_semaphore, #tpu.memory_space<semaphore_mem>>) src(%164 : memref<1x128xf32, #tpu.memory_space<vmem>>) dst(%165 : memref<1x128xf32, #tpu.memory_space<any>>)
    return
  }
  func.func @transform_0(%arg0: i32, %arg1: memref<8xi32, #tpu.memory_space<smem>>) -> (i32, i32) {
    %c0_i32 = arith.constant 0 : i32
    %c0_i32_0 = arith.constant 0 : i32
    %c0_i32_1 = arith.constant 0 : i32
    return %c0_i32, %c0_i32_0 : i32, i32
  }
  func.func @transform_1(%arg0: i32, %arg1: memref<8xi32, #tpu.memory_space<smem>>) -> (i32, i32) {
    %c0_i32 = arith.constant 0 : i32
    %c0_i32_0 = arith.constant 0 : i32
    %c0_i32_1 = arith.constant 0 : i32
    return %c0_i32, %c0_i32_0 : i32, i32
  }
  func.func @transform_3(%arg0: i32, %arg1: memref<8xi32, #tpu.memory_space<smem>>) -> (i32, i32) {
    %c0_i32 = arith.constant 0 : i32
    %c0_i32_0 = arith.constant 0 : i32
    %c0_i32_1 = arith.constant 0 : i32
    return %c0_i32, %c0_i32_0 : i32, i32
  }
  func.func @transform_5(%arg0: i32, %arg1: memref<8xi32, #tpu.memory_space<smem>>) -> (i32, i32) {
    %c0_i32 = arith.constant 0 : i32
    %c0_i32_0 = arith.constant 0 : i32
    %c0_i32_1 = arith.constant 0 : i32
    return %c0_i32, %c0_i32_0 : i32, i32
  }
}

</mosaic_0001>

<bundles_post_ra>
// kernel: tpu_custom_call.1
= control target key start
LH: loop header
LB: loop body
LE: loop exit
PB: predicated region body
PF: predicated region fallthrough
CT: control target
= control target key end

     0   :  { %s1564_s0 = inlined_call_operand.vmem [shape: s32[8], index: 0, kind: input, shape index: {}]   ;;  %s1565_s1 = inlined_call_operand.vmem [shape: f32[8,128], index: 1, kind: input, shape index: {}]   ;;  %s1566_s2 = inlined_call_operand.vmem [shape: s32[1,8], index: 2, kind: input, shape index: {}]   ;;  %s1567_s3 = inlined_call_operand.hbm [shape: f32[64,128], index: 3, kind: input, shape index: {}, may-alias: {3,5}]   ;;  %s1568_s4 = inlined_call_operand.hbm [shape: f32[8,128], index: 4, kind: input, shape index: {}, may-alias: {4,6}]   ;;  %s1569_s5 = inlined_call_operand.hbm [shape: f32[64,128], index: 5, kind: output, shape index: {0}, may-alias: {3,5}]   ;;  %s1570_s6 = inlined_call_operand.hbm [shape: f32[8,128], index: 6, kind: output, shape index: {1}, may-alias: {4,6}]  }
   0x1   :  { %1602 = sst [smem:[#allocation77_spill]] %s1570_s6  ;;  %s12_s23 = sshll.u32 %s1564_s0, 4  ;;  %s13_s23 = int_to_ptr.vmem [resolvable:$true] %s12_s23 }
   0x2   :  { %s641_s24 = scalar_lea.vmem %s13_s23, 16  ;;  %p646_p1 = scmp.lt.s32.totalorder %s13_s23, %s13_s23 }
   0x3   :  { %p642_p0 = scmp.ne.s32.totalorder %s13_s23, %s641_s24  ;;  %p647_p2 = scmp.lt.s32.totalorder %s641_s24, %s641_s24 }
   0x5   :  { %p648_p3 = por %p647_p2, %p646_p1 }
   0x7   :  { %p649_p4 = pnand %p648_p3, %p642_p0 }
   0x9   :  { %652 = shalt.err (!%p649_p4)  }
   0xa   :  { %s1083_s25 = smov [#allocation6]  }
   0xb   :  { %15 = dma.vmem_to_smem %s13_s23, 16, %s1083_s25, [#allocation5] }
   0xc   :  { %1045 = dma.done.wait [#allocation5], 16 }
   0xd   :  { %1046 = vsyncadd [#allocation5], 4294967280 }
   0xe   :  { %17 = sfence }
   0xf   :  { %18 = vsyncpa [#allocation8], 0 }
  0x10   :  { %19 = vsyncpa [#allocation9], 0  ;;  %s1084_s26 = smov [#allocation7]  }
  0x11   :  { %s30_s27 = sshll.u32 %s1084_s26, 4  ;;  %s31_s27 = int_to_ptr.vmem [resolvable:$true] %s30_s27 }
  0x12   :  { %s661_s28 = scalar_lea.vmem %s31_s27, 128  ;;  %p666_p6 = scmp.lt.s32.totalorder %s31_s27, %s31_s27 }
  0x13   :  { %p662_p5 = scmp.ne.s32.totalorder %s31_s27, %s661_s28  ;;  %p667_p7 = scmp.lt.s32.totalorder %s661_s28, %s661_s28 }
  0x15   :  { %p668_p8 = por %p667_p7, %p666_p6 }
  0x17   :  { %p669_p9 = pnand %p668_p8, %p662_p5 }
  0x19   :  { %672 = shalt.err (!%p669_p9)
}
  0x1a   :  { %33 = dma.hbm_to_vmem [thread:$0]  %s1568_s4, 128, %s31_s27, [#allocation8]  }
  0x1b   :  { %1047 = dma.done.wait [#allocation8], 128  }
  0x1c   :  { %1048 = vsyncadd [#allocation8], 4294967168  ;;  %v163_v0 = vlaneseq  ;;  %s37_s30 = sld [smem:[#allocation6]]  ;;  %s1085_s7 = smov [#allocation2]   ;;  %v585_v2 = vld [vmem:[%s1566_s2] ss:$0 sm:$0xff] }
  0x1d   :  { %s47_s8 = sshll.u32 %s1085_s7, 4  ;;  %s1139_s9 = sld [smem:[#allocation6 + $0x1]]  ;;  %v1089_v3 = vmov 0.0   ;;  %s1137_s8 = int_to_ptr.vmem [resolvable:$true] %s47_s8 }
  0x1e   :  { %s1086_s10 = smov [#allocation2 + $0x1]   ;;  %s1141_s12 = sld [smem:[#allocation6 + $0x2]]  ;;  %v164_v1 = vshrl.u32 %v163_v0, 7 }
  0x1f   :  { %s63_s11 = sshll.u32 %s1086_s10, 4  ;;  %s1087_s13 = smov [#allocation2 + $0x2]   ;;  %s1143_s11 = int_to_ptr.vmem [resolvable:$true] %s63_s11 }
  0x20   :  { %s79_s4 = sshll.u32 %s1087_s13, 4  ;;  %s1145_s14 = sld [smem:[#allocation6 + $0x3]]  ;;  %vm170_vm0 = vcmp.eq.s32.totalorder %v164_v1, %v585_v2  ;;  %s1147_s4 = int_to_ptr.vmem [resolvable:$true] %s79_s4 }
  0x21   :  { %s1088_s18 = smov [#allocation2 + $0x3]   ;;  %v1159_v4 = vsel %vm170_vm0, 1.0, %v1089_v3  ;;  %s1164_s2 = scalar_lea.hbm %s1567_s3, 1024 }
  0x22   :  { %s570_s17 = sshll.u32 %s37_s30, 4  ;;  %s1152_s19 = sshll.u32 %s1088_s18, 4  ;;  %s1262_s19 = int_to_ptr.vmem [resolvable:$true] %s1152_s19 }
  0x23   :  { %s39_s22 = scalar_lea.hbm %s1567_s3, %s570_s17  ;;  %s572_s23 = sshll.u32 %s1139_s9, 4 }
  0x24   :  { %s673_s24 = scalar_lea.hbm %s39_s22, 16  ;;  %p676_p11 = scmp.lt.s32.totalorder %s39_s22, %s1567_s3 }
  0x25   :  { %p674_p10 = scmp.ne.s32.totalorder %s39_s22, %s673_s24  ;;  %p677_p12 = scmp.lt.s32.totalorder %s1164_s2, %s673_s24 }
  0x27   :  { %p678_p13 = por %p677_p12, %p676_p11 }
  0x29   :  { %p679_p0 = pnand %p678_p13, %p674_p10 }
  0x2b   :  { %682 = shalt.err (!%p679_p0)  }
  0x2c   :  { %s683_s0 = scalar_lea.vmem %s1137_s8, 16  ;;  %s1177_s30 = scalar_lea.vmem %s1137_s8, 128 }
  0x2d   :  { %p1172_p1 = scmp.ne.s32.totalorder %s1137_s8, %s683_s0  ;;  %p688_p2 = scmp.lt.s32.totalorder %s1137_s8, %s1137_s8 }
  0x2e   :  { %p689_p3 = scmp.lt.s32.totalorder %s1177_s30, %s683_s0 }
  0x30   :  { %p1182_p4 = por %p689_p3, %p688_p2 }
  0x32   :  { %p1573_p5 = pnand %p1182_p4, %p1172_p1 }
  0x34   :  { %694 = shalt.err (!%p1573_p5)  }
  0x35   :  { %50 = dma.hbm_to_vmem [thread:$0]  %s39_s22, 16, %s1137_s8, [#allocation3] }
  0x36   :  { %s53_s13 = scalar_lea.hbm %s1567_s3, %s572_s23  ;;  %s574_s15 = sshll.u32 %s1141_s12, 4 }
  0x37   :  { %s695_s16 = scalar_lea.hbm %s53_s13, 16  ;;  %p698_p7 = scmp.lt.s32.totalorder %s53_s13, %s1567_s3 }
  0x38   :  { %p696_p6 = scmp.ne.s32.totalorder %s53_s13, %s695_s16  ;;  %p699_p8 = scmp.lt.s32.totalorder %s1164_s2, %s695_s16 }
  0x3a   :  { %p700_p9 = por %p699_p8, %p698_p7 }
  0x3c   :  { %p701_p10 = pnand %p700_p9, %p696_p6 }
  0x3e   :  { %704 = shalt.err (!%p701_p10)  }
  0x3f   :  { %s705_s20 = scalar_lea.vmem %s1143_s11, 16  ;;  %p710_p12 = scmp.lt.s32.totalorder %s1143_s11, %s1137_s8 }
  0x40   :  { %p1206_p11 = scmp.ne.s32.totalorder %s1143_s11, %s705_s20  ;;  %p711_p13 = scmp.lt.s32.totalorder %s1177_s30, %s705_s20 }
  0x42   :  { %p1213_p0 = por %p711_p13, %p710_p12 }
  0x44   :  { %p1571_p2 = pnand %p1213_p0, %p1206_p11 }
  0x46   :  { %716 = shalt.err (!%p1571_p2)  }
  0x47   :  { %66 = dma.hbm_to_vmem [thread:$0]  %s53_s13, 16, %s1143_s11, [#allocation3 + $0x1] }
  0x48   :  { %s69_s24 = scalar_lea.hbm %s1567_s3, %s574_s15  ;;  %s576_s25 = sshll.u32 %s1145_s14, 4 }
  0x49   :  { %s717_s26 = scalar_lea.hbm %s69_s24, 16  ;;  %p720_p6 = scmp.lt.s32.totalorder %s69_s24, %s1567_s3 }
  0x4a   :  { %p718_p3 = scmp.ne.s32.totalorder %s69_s24, %s717_s26  ;;  %p721_p7 = scmp.lt.s32.totalorder %s1164_s2, %s717_s26 }
  0x4c   :  { %p722_p8 = por %p721_p7, %p720_p6 }
  0x4e   :  { %p723_p9 = pnand %p722_p8, %p718_p3 }
  0x50   :  { %726 = shalt.err (!%p723_p9)  }
  0x51   :  { %s727_s0 = scalar_lea.vmem %s1147_s4, 16  ;;  %p732_p12 = scmp.lt.s32.totalorder %s1147_s4, %s1137_s8 }
  0x52   :  { %p1237_p10 = scmp.ne.s32.totalorder %s1147_s4, %s727_s0  ;;  %p733_p13 = scmp.lt.s32.totalorder %s1177_s30, %s727_s0 }
  0x54   :  { %s1607_s9 = scalar_select %p1237_p10, 1, 0 }
  0x55   :  { %p1244_p2 = por %p733_p13, %p732_p12 }
  0x57   :  { %p1572_p3 = pnand %p1244_p2, %p1237_p10 }
  0x59   :  { %738 = shalt.err (!%p1572_p3)  }
  0x5a   :  { %82 = dma.hbm_to_vmem [thread:$0]  %s69_s24, 16, %s1147_s4, [#allocation3 + $0x2] }
  0x5b   :  { %s85_s15 = scalar_lea.hbm %s1567_s3, %s576_s25  ;;  %1609 = sst [smem:[#allocation64_spill]] %s1262_s19 }
  0x5c   :  { %s739_s16 = scalar_lea.hbm %s85_s15, 16  ;;  %p742_p7 = scmp.lt.s32.totalorder %s85_s15, %s1567_s3 }
  0x5d   :  { %p740_p6 = scmp.ne.s32.totalorder %s85_s15, %s739_s16  ;;  %p743_p8 = scmp.lt.s32.totalorder %s1164_s2, %s739_s16 }
  0x5f   :  { %p744_p9 = por %p743_p8, %p742_p7 }
  0x61   :  { %p745_p12 = pnand %p744_p9, %p740_p6 }
  0x63   :  { %748 = shalt.err (!%p745_p12)  }
  0x64   :  { %s749_s20 = scalar_lea.vmem %s1262_s19, 16  ;;  %p754_p3 = scmp.lt.s32.totalorder %s1262_s19, %s1137_s8 }
  0x65   :  { %p1270_p13 = scmp.ne.s32.totalorder %s1262_s19, %s749_s20  ;;  %p755_p5 = scmp.lt.s32.totalorder %s1177_s30, %s749_s20 }
  0x67   :  { %s1610_s22 = scalar_select %p1270_p13, 1, 0 }
  0x68   :  { %p1277_p10 = por %p755_p5, %p754_p3 }
  0x69   :  { %1611 = sst [smem:[#allocation65_spill]] %s1610_s22 }
  0x6a   :  { %s1612_s23 = scalar_select %p1277_p10, 1, 0 }
  0x6b   :  { %p1577_p6 = pnand %p1277_p10, %p1270_p13 }
  0x6d   :  { %760 = shalt.err (!%p1577_p6)  }
  0x6e   :  { %98 = dma.hbm_to_vmem [thread:$0]  %s85_s15, 16, %s1262_s19, [#allocation3 + $0x3] }
  0x6f   :  { %s577_s24 = sld [smem:[#allocation6 + $0x4]]  ;;  %s1090_s25 = smov [#allocation2 + $0x4]  }
  0x70   :  { %s111_s26 = sshll.u32 %s1090_s25, 4  ;;  %s1291_s27 = sld [smem:[#allocation6 + $0x5]]  ;;  %s1293_s26 = int_to_ptr.vmem [resolvable:$true] %s111_s26 }
  0x71   :  { %1613 = sst [smem:[#allocation66_spill]] %s1293_s26  ;;  %s1091_s28 = smov [#allocation2 + $0x5]  }
  0x72   :  { %s127_s0 = sshll.u32 %s1091_s28, 4  ;;  %s1295_s10 = sld [smem:[#allocation6 + $0x6]]  ;;  %s1297_s0 = int_to_ptr.vmem [resolvable:$true] %s127_s0 }
  0x73   :  { %1614 = sst [smem:[#allocation67_spill]] %s1297_s0  ;;  %s1092_s13 = smov [#allocation2 + $0x6]  }
  0x74   :  { %s143_s16 = sshll.u32 %s1092_s13, 4  ;;  %s1299_s17 = sld [smem:[#allocation6 + $0x7]]  ;;  %s1301_s16 = int_to_ptr.vmem [resolvable:$true] %s143_s16 }
  0x75   :  { %s578_s15 = sshll.u32 %s577_s24, 4  ;;  %1615 = sst [smem:[#allocation68_spill]] %s1301_s16 }
  0x76   :  { %s101_s25 = scalar_lea.hbm %s1567_s3, %s578_s15  ;;  %s580_s6 = sshll.u32 %s1291_s27, 4 }
  0x77   :  { %s761_s19 = scalar_lea.hbm %s101_s25, 16  ;;  %p764_p3 = scmp.lt.s32.totalorder %s101_s25, %s1567_s3 }
  0x78   :  { %p762_p5 = scmp.ne.s32.totalorder %s101_s25, %s761_s19  ;;  %p765_p7 = scmp.lt.s32.totalorder %s1164_s2, %s761_s19 }
  0x7a   :  { %p766_p8 = por %p765_p7, %p764_p3 }
  0x7c   :  { %p767_p9 = pnand %p766_p8, %p762_p5 }
  0x7e   :  { %770 = shalt.err (!%p767_p9)  }
  0x7f   :  { %s771_s24 = scalar_lea.vmem %s1293_s26, 16  ;;  %p776_p6 = scmp.lt.s32.totalorder %s1293_s26, %s1137_s8 }
  0x80   :  { %p1313_p12 = scmp.ne.s32.totalorder %s1293_s26, %s771_s24  ;;  %p777_p13 = scmp.lt.s32.totalorder %s1177_s30, %s771_s24 }
  0x82   :  { %s1616_s13 = scalar_select %p1313_p12, 1, 0 }
  0x83   :  { %p1320_p10 = por %p777_p13, %p776_p6 }
  0x84   :  { %1617 = sst [smem:[#allocation69_spill]] %s1616_s13 }
  0x85   :  { %s1618_s22 = scalar_select %p1320_p10, 1, 0 }
  0x86   :  { %p1580_p5 = pnand %p1320_p10, %p1313_p12 }
  0x88   :  { %782 = shalt.err (!%p1580_p5)  }
  0x89   :  { %114 = dma.hbm_to_vmem [thread:$0]  %s101_s25, 16, %s1293_s26, [#allocation3 + $0x4] }
  0x8a   :  { %s117_s15 = scalar_lea.hbm %s1567_s3, %s580_s6  ;;  %s582_s18 = sshll.u32 %s1295_s10, 4 }
  0x8b   :  { %s783_s20 = scalar_lea.hbm %s117_s15, 16  ;;  %p786_p6 = scmp.lt.s32.totalorder %s117_s15, %s1567_s3 }
  0x8c   :  { %p784_p13 = scmp.ne.s32.totalorder %s117_s15, %s783_s20  ;;  %p787_p3 = scmp.lt.s32.totalorder %s1164_s2, %s783_s20 }
  0x8e   :  { %p788_p7 = por %p787_p3, %p786_p6 }
  0x90   :  { %p789_p8 = pnand %p788_p7, %p784_p13 }
  0x92   :  { %792 = shalt.err (!%p789_p8)  }
  0x93   :  { %s793_s25 = scalar_lea.vmem %s1297_s0, 16  ;;  %p798_p5 = scmp.lt.s32.totalorder %s1297_s0, %s1137_s8 }
  0x94   :  { %p1344_p9 = scmp.ne.s32.totalorder %s1297_s0, %s793_s25  ;;  %p799_p12 = scmp.lt.s32.totalorder %s1177_s30, %s793_s25 }
  0x96   :  { %s1619_s19 = scalar_select %p1344_p9, 1, 0 }
  0x97   :  { %p1351_p10 = por %p799_p12, %p798_p5 }
  0x98   :  { %1620 = sst [smem:[#allocation70_spill]] %s1619_s19 }
  0x99   :  { %s1621_s6 = scalar_select %p1351_p10, 1, 0 }
  0x9a   :  { %p1584_p13 = pnand %p1351_p10, %p1344_p9 }
  0x9b   :  { %1622 = sst [smem:[#allocation71_spill]] %s1621_s6 }
  0x9c   :  { %804 = shalt.err (!%p1584_p13)  }
  0x9d   :  { %130 = dma.hbm_to_vmem [thread:$0]  %s117_s15, 16, %s1297_s0, [#allocation3 + $0x5] }
  0x9e   :  { %s133_s20 = scalar_lea.hbm %s1567_s3, %s582_s18  ;;  %s584_s28 = sshll.u32 %s1299_s17, 4 }
  0x9f   :  { %s805_s24 = scalar_lea.hbm %s133_s20, 16  ;;  %p808_p5 = scmp.lt.s32.totalorder %s133_s20, %s1567_s3 }
  0xa0   :  { %p806_p12 = scmp.ne.s32.totalorder %s133_s20, %s805_s24  ;;  %p809_p6 = scmp.lt.s32.totalorder %s1164_s2, %s805_s24 }
  0xa2   :  { %p810_p3 = por %p809_p6, %p808_p5 }
  0xa4   :  { %p811_p7 = pnand %p810_p3, %p806_p12 }
  0xa6   :  { %814 = shalt.err (!%p811_p7)  }
  0xa7   :  { %s815_s15 = scalar_lea.vmem %s1301_s16, 16  ;;  %p820_p13 = scmp.lt.s32.totalorder %s1301_s16, %s1137_s8 }
  0xa8   :  { %p1375_p8 = scmp.ne.s32.totalorder %s1301_s16, %s815_s15  ;;  %p821_p9 = scmp.lt.s32.totalorder %s1177_s30, %s815_s15 }
  0xaa   :  { %s1623_s10 = scalar_select %p1375_p8, 1, 0 }
  0xab   :  { %p1382_p10 = por %p821_p9, %p820_p13 }
  0xac   :  { %1624 = sst [smem:[#allocation72_spill]] %s1623_s10 }
  0xad   :  { %s1625_s26 = scalar_select %p1382_p10, 1, 0 }
  0xae   :  { %p1589_p12 = pnand %p1382_p10, %p1375_p8 }
  0xaf   :  { %1626 = sst [smem:[#allocation73_spill]] %s1625_s26 }
  0xb0   :  { %826 = shalt.err (!%p1589_p12)  }
  0xb1   :  { %146 = dma.hbm_to_vmem [thread:$0]  %s133_s20, 16, %s1301_s16, [#allocation3 + $0x6] }
  0xb2   :  { %s149_s27 = scalar_lea.hbm %s1567_s3, %s584_s28  ;;  %s1093_s24 = smov [#allocation2 + $0x7]  }
  0xb3   :  { %s159_s25 = sshll.u32 %s1093_s24, 4  ;;  %s827_s15 = scalar_lea.hbm %s149_s27, 16  ;;  %s1399_s25 = int_to_ptr.vmem [resolvable:$true] %s159_s25 }
  0xb4   :  { %1627 = sst [smem:[#allocation74_spill]] %s1399_s25  ;;  %p828_p9 = scmp.ne.s32.totalorder %s149_s27, %s827_s15 }
  0xb5   :  { %p830_p13 = scmp.lt.s32.totalorder %s149_s27, %s1567_s3  ;;  %p831_p5 = scmp.lt.s32.totalorder %s1164_s2, %s827_s15 }
  0xb7   :  { %p832_p6 = por %p831_p5, %p830_p13 }
  0xb9   :  { %p833_p3 = pnand %p832_p6, %p828_p9 }
  0xbb   :  { %836 = shalt.err (!%p833_p3)  }
  0xbc   :  { %s837_s20 = scalar_lea.vmem %s1399_s25, 16  ;;  %p842_p12 = scmp.lt.s32.totalorder %s1399_s25, %s1137_s8 }
  0xbd   :  { %p1407_p7 = scmp.ne.s32.totalorder %s1399_s25, %s837_s20  ;;  %p843_p8 = scmp.lt.s32.totalorder %s1177_s30, %s837_s20 }
  0xbf   :  { %s1628_s28 = scalar_select %p1407_p7, 1, 0 }
  0xc0   :  { %p1414_p10 = por %p843_p8, %p842_p12 }
  0xc1   :  { %1629 = sst [smem:[#allocation75_spill]] %s1628_s28 }
  0xc2   :  { %s1630_s3 = scalar_select %p1414_p10, 1, 0 }
  0xc3   :  { %p1600_p9 = pnand %p1414_p10, %p1407_p7 }
  0xc4   :  { %1631 = sst [smem:[#allocation76_spill]] %s1630_s3 }
  0xc5   :  { %848 = shalt.err (!%p1600_p9)  }
  0xc6   :  { %162 = dma.hbm_to_vmem [thread:$0]  %s149_s27, 16, %s1399_s25, [#allocation3 + $0x7] }
  0xc7   :  { %1049 = dma.done.wait [#allocation3], 16 }
  0xc8   :  { %1050 = vsyncadd [#allocation3], 4294967280 }
  0xc9   :  { %1051 = dma.done.wait [#allocation3 + $0x1], 16 }
  0xca   :  { %1052 = vsyncadd [#allocation3 + $0x1], 4294967280 }
  0xcb   :  { %1053 = dma.done.wait [#allocation3 + $0x2], 16 }
  0xcc   :  { %1054 = vsyncadd [#allocation3 + $0x2], 4294967280 }
  0xcd   :  { %1055 = dma.done.wait [#allocation3 + $0x3], 16 }
  0xce   :  { %1056 = vsyncadd [#allocation3 + $0x3], 4294967280 }
  0xcf   :  { %1057 = dma.done.wait [#allocation3 + $0x4], 16 }
  0xd0   :  { %1058 = vsyncadd [#allocation3 + $0x4], 4294967280 }
  0xd1   :  { %1059 = dma.done.wait [#allocation3 + $0x5], 16 }
  0xd2   :  { %1060 = vsyncadd [#allocation3 + $0x5], 4294967280 }
  0xd3   :  { %1061 = dma.done.wait [#allocation3 + $0x6], 16 }
  0xd4   :  { %1062 = vsyncadd [#allocation3 + $0x6], 4294967280 }
  0xd5   :  { %1063 = dma.done.wait [#allocation3 + $0x7], 16 }
  0xd6   :  { %1064 = vsyncadd [#allocation3 + $0x7], 4294967280  ;;  %621 = vmatprep.subr.mxu0 %v1089_v3  ;;  %v190_v5 = vld [vmem:[#allocation2] sm:$0xff]  ;;  %vm1094_vm1 = vmmov 0   ;;  %s201_s0 = sld [smem:[#allocation6]]  ;;  %vm321_vm2 = vcmask 64512   ;;  %p1632_p8 = pnand %p1182_p4, %p1172_p1 }
  0xd7   :  { %v192_v6 = vld [vmem:[%s1565_s1] sm:$0xff]  ;;  %v191_v7 = vmul.f32 0.1, %v190_v5  ;;  %623 = vmatprep.mubr.msk.f32.mxu0 %vm1094_vm1, %v1089_v3  ;;  %s588_s19 = sld [smem:[#allocation6 + $0x1]] }
  0xd8   :  { %v193_v8 = vmul.f32 0.9, %v192_v6  ;;  %s590_s17 = sld [smem:[#allocation6 + $0x2]] }
  0xd9   :  { %s592_s18 = sld [smem:[#allocation6 + $0x3]] }
  0xda   :  { %v194_v9 = vadd.f32 %v193_v8, %v191_v7  ;;  %s594_s27 = sld [smem:[#allocation6 + $0x4]] }
  0xdc   :  { %v195_v10 = vmul.f32 %v194_v9, %v194_v9  ;;  %s587_s24 = sshll.u32 %s201_s0, 4 }
  0xdd   :  { %s589_s15 = sshll.u32 %s588_s19, 4  ;;  %s203_s28 = scalar_lea.hbm %s1569_s5, %s587_s24 }
  0xde   :  { %196 = vadd.xlane.f32.xlu0 %v195_v10  ;;  %s591_s1 = sshll.u32 %s590_s17, 4  ;;  %s217_s10 = scalar_lea.hbm %s1569_s5, %s589_s15 }
  0xdf   :  { %s593_s20 = sshll.u32 %s592_s18, 4  ;;  %s1442_s0 = scalar_lea.hbm %s1569_s5, %s591_s1 }
  0xe0   :  { %s595_s2 = sshll.u32 %s594_s27, 4  ;;  %s1447_s18 = scalar_lea.hbm %s1569_s5, %s593_s20 }
  0xe1   :  { %s1452_s25 = scalar_lea.hbm %s1569_s5, %s595_s2 }
 0x167   :  { %v197_v11 = vpop.xlane.xlu0 %196 }
 0x168   :  { %639 = vrsqrt.f32 %v197_v11 }
 0x175   :  { %v640_v12 = vpop.eup %639 }
 0x176   :  { %v199_v13 = vmul.f32 %v640_v12, %v194_v9 }
 0x178   :  { %200 = vst [vmem:[#allocation2] sm:$0xff] %v199_v13  ;;  %622 = vmatpush3.msra.mxu0 %v199_v13 }
 0x179   :  { %624 = vmatmul.mubr.msk.f32.vlgmr.msra.gmra.mxu0 %vm321_vm2, %v1159_v4 }
 0x17a   :  { %860 = shalt.err (!%p1632_p8)  }
 0x17b   :  { %s861_s16 = scalar_lea.hbm %s203_s28, 16  ;;  %s1463_s3 = scalar_lea.hbm %s1569_s5, 1024 }
 0x17c   :  { %p862_p12 = scmp.ne.s32.totalorder %s203_s28, %s861_s16  ;;  %p864_p13 = scmp.lt.s32.totalorder %s203_s28, %s1569_s5 }
 0x17d   :  { %p865_p5 = scmp.lt.s32.totalorder %s1463_s3, %s861_s16 }
 0x17f   :  { %p866_p6 = por %p865_p5, %p864_p13 }
 0x181   :  { %p867_p3 = pnand %p866_p6, %p862_p12 }
 0x183   :  { %870 = shalt.err (!%p867_p3)  }
 0x184   :  { %214 = dma.vmem_to_hbm [thread:$0]  %s1137_s8, 16, %s203_s28, [#allocation4] }
 0x185   :  { %p1633_p1 = pnand %p1213_p0, %p1206_p11 }
 0x187   :  { %882 = shalt.err (!%p1633_p1)  }
 0x188   :  { %s883_s29 = scalar_lea.hbm %s217_s10, 16  ;;  %p886_p8 = scmp.lt.s32.totalorder %s217_s10, %s1569_s5 }
 0x189   :  { %p884_p4 = scmp.ne.s32.totalorder %s217_s10, %s883_s29  ;;  %p887_p9 = scmp.lt.s32.totalorder %s1463_s3, %s883_s29 }
 0x18b   :  { %p888_p7 = por %p887_p9, %p886_p8 }
 0x18d   :  { %p889_p13 = pnand %p888_p7, %p884_p4 }
 0x18f   :  { %892 = shalt.err (!%p889_p13)  }
 0x190   :  { %229 = dma.vmem_to_hbm [thread:$0]  %s1143_s11, 16, %s217_s10, [#allocation4 + $0x1] }
 0x191   :  { %p1634_p12 = scmp.ne.s32.totalorder %s1607_s9, 0 }
 0x193   :  { %p1635_p5 = pnand %p1244_p2, %p1634_p12 }
 0x195   :  { %904 = shalt.err (!%p1635_p5)  }
 0x196   :  { %s905_s8 = scalar_lea.hbm %s1442_s0, 16  ;;  %p908_p0 = scmp.lt.s32.totalorder %s1442_s0, %s1569_s5 }
 0x197   :  { %p906_p11 = scmp.ne.s32.totalorder %s1442_s0, %s905_s8  ;;  %p909_p7 = scmp.lt.s32.totalorder %s1463_s3, %s905_s8 }
 0x199   :  { %p910_p9 = por %p909_p7, %p908_p0 }
 0x19b   :  { %p911_p6 = pnand %p910_p9, %p906_p11 }
 0x19d   :  { %914 = shalt.err (!%p911_p6)  }
 0x19e   :  { %s1636_s11 = sld [smem:[#allocation65_spill]]  ;;  %p1637_p2 = scmp.ne.s32.totalorder %s1612_s23, 0 }
 0x19f   :  { %244 = dma.vmem_to_hbm [thread:$0]  %s1147_s4, 16, %s1442_s0, [#allocation4 + $0x2] }
 0x1a4   :  { %p1638_p3 = scmp.ne.s32.totalorder %s1636_s11, 0 }
 0x1a6   :  { %p1639_p1 = pnand %p1637_p2, %p1638_p3 }
 0x1a8   :  { %926 = shalt.err (!%p1639_p1)  }
 0x1a9   :  { %s927_s9 = scalar_lea.hbm %s1447_s18, 16  ;;  %p930_p8 = scmp.lt.s32.totalorder %s1447_s18, %s1569_s5 }
 0x1aa   :  { %p928_p4 = scmp.ne.s32.totalorder %s1447_s18, %s927_s9  ;;  %p931_p13 = scmp.lt.s32.totalorder %s1463_s3, %s927_s9 }
 0x1ac   :  { %p932_p12 = por %p931_p13, %p930_p8 }
 0x1ae   :  { %p933_p5 = pnand %p932_p12, %p928_p4 }
 0x1b0   :  { %936 = shalt.err (!%p933_p5)  }
 0x1b1   :  { %s1640_s4 = sld [smem:[#allocation64_spill]]  ;;  %p1642_p11 = scmp.ne.s32.totalorder %s1618_s22, 0 }
 0x1b2   :  { %s1641_s23 = sld [smem:[#allocation69_spill]] }
 0x1b7   :  { %259 = dma.vmem_to_hbm [thread:$0]  %s1640_s4, 16, %s1447_s18, [#allocation4 + $0x3] }
 0x1b8   :  { %p1643_p0 = scmp.ne.s32.totalorder %s1641_s23, 0 }
 0x1ba   :  { %p1644_p7 = pnand %p1642_p11, %p1643_p0 }
 0x1bc   :  { %948 = shalt.err (!%p1644_p7)  }
 0x1bd   :  { %s949_s28 = scalar_lea.hbm %s1452_s25, 16  ;;  %p952_p6 = scmp.lt.s32.totalorder %s1452_s25, %s1569_s5 }
 0x1be   :  { %p950_p9 = scmp.ne.s32.totalorder %s1452_s25, %s949_s28  ;;  %p953_p2 = scmp.lt.s32.totalorder %s1463_s3, %s949_s28 }
 0x1c0   :  { %p954_p3 = por %p953_p2, %p952_p6 }
 0x1c2   :  { %p955_p1 = pnand %p954_p3, %p950_p9 }
 0x1c4   :  { %958 = shalt.err (!%p955_p1)  }
 0x1c5   :  { %s1645_s2 = sld [smem:[#allocation66_spill]] }
 0x1c6   :  { %s1646_s22 = sld [smem:[#allocation71_spill]] }
 0x1c7   :  { %s1647_s30 = sld [smem:[#allocation70_spill]] }
 0x1c8   :  { %s596_s0 = sld [smem:[#allocation6 + $0x5]] }
 0x1c9   :  { %s598_s19 = sld [smem:[#allocation6 + $0x6]] }
 0x1ca   :  { %s600_s17 = sld [smem:[#allocation6 + $0x7]] }
 0x1cb   :  { %274 = dma.vmem_to_hbm [thread:$0]  %s1645_s2, 16, %s1452_s25, [#allocation4 + $0x4] }
 0x1cc   :  { %p1648_p4 = scmp.ne.s32.totalorder %s1646_s22, 0 }
 0x1cd   :  { %p1649_p8 = scmp.ne.s32.totalorder %s1647_s30, 0 }
 0x1ce   :  { %s597_s18 = sshll.u32 %s596_s0, 4 }
 0x1cf   :  { %s277_s6 = scalar_lea.hbm %s1569_s5, %s597_s18  ;;  %s599_s26 = sshll.u32 %s598_s19, 4 }
 0x1d0   :  { %p1650_p13 = pnand %p1648_p4, %p1649_p8 }
 0x1d2   :  { %970 = shalt.err (!%p1650_p13)  }
 0x1d3   :  { %s971_s24 = scalar_lea.hbm %s277_s6, 16  ;;  %p974_p5 = scmp.lt.s32.totalorder %s277_s6, %s1569_s5 }
 0x1d4   :  { %p972_p12 = scmp.ne.s32.totalorder %s277_s6, %s971_s24  ;;  %p975_p11 = scmp.lt.s32.totalorder %s1463_s3, %s971_s24 }
 0x1d6   :  { %p976_p0 = por %p975_p11, %p974_p5 }
 0x1d8   :  { %p977_p7 = pnand %p976_p0, %p972_p12 }
 0x1da   :  { %980 = shalt.err (!%p977_p7)  }
 0x1db   :  { %s1651_s25 = sld [smem:[#allocation67_spill]]  ;;  %s292_s12 = scalar_lea.hbm %s1569_s5, %s599_s26 }
 0x1dc   :  { %s1652_s7 = sld [smem:[#allocation73_spill]]  ;;  %s601_s11 = sshll.u32 %s600_s17, 4 }
 0x1dd   :  { %s1653_s13 = sld [smem:[#allocation72_spill]] }
 0x1e1   :  { %289 = dma.vmem_to_hbm [thread:$0]  %s1651_s25, 16, %s277_s6, [#allocation4 + $0x5] }
 0x1e2   :  { %p1654_p9 = scmp.ne.s32.totalorder %s1652_s7, 0 }
 0x1e3   :  { %p1655_p6 = scmp.ne.s32.totalorder %s1653_s13, 0 }
 0x1e5   :  { %p1656_p2 = pnand %p1654_p9, %p1655_p6 }
 0x1e7   :  { %992 = shalt.err (!%p1656_p2)  }
 0x1e8   :  { %s993_s9 = scalar_lea.hbm %s292_s12, 16  ;;  %p996_p1 = scmp.lt.s32.totalorder %s292_s12, %s1569_s5 }
 0x1e9   :  { %p994_p3 = scmp.ne.s32.totalorder %s292_s12, %s993_s9  ;;  %p997_p4 = scmp.lt.s32.totalorder %s1463_s3, %s993_s9 }
 0x1eb   :  { %p998_p8 = por %p997_p4, %p996_p1 }
 0x1ed   :  { %p999_p13 = pnand %p998_p8, %p994_p3 }
 0x1ef   :  { %1002 = shalt.err (!%p999_p13)  }
 0x1f0   :  { %s1657_s4 = sld [smem:[#allocation68_spill]]  ;;  %s307_s2 = scalar_lea.hbm %s1569_s5, %s601_s11 }
 0x1f1   :  { %s1659_s28 = sld [smem:[#allocation75_spill]] }
 0x1f6   :  { %304 = dma.vmem_to_hbm [thread:$0]  %s1657_s4, 16, %s292_s12, [#allocation4 + $0x6] }
 0x1f7   :  { %p1660_p12 = scmp.ne.s32.totalorder %s1659_s28, 0 }
 0x1f9   :  { %p1661_p5 = pnand %p1414_p10, %p1660_p12 }
 0x1fb   :  { %1014 = shalt.err (!%p1661_p5)  }
 0x1fc   :  { %s1015_s22 = scalar_lea.hbm %s307_s2, 16  ;;  %p1018_p0 = scmp.lt.s32.totalorder %s307_s2, %s1569_s5 }
 0x1fd   :  { %p1016_p11 = scmp.ne.s32.totalorder %s307_s2, %s1015_s22  ;;  %p1019_p7 = scmp.lt.s32.totalorder %s1463_s3, %s1015_s22 }
 0x1ff   :  { %p1020_p9 = por %p1019_p7, %p1018_p0 }
 0x201   :  { %p1021_p6 = pnand %p1020_p9, %p1016_p11 }
 0x203   :  { %1024 = shalt.err (!%p1021_p6)  }
 0x204   :  { %s1662_s19 = sld [smem:[#allocation74_spill]]  ;;  %v320_v14 = vld [vmem:[#allocation7] sm:$0xff] }
 0x20a   :  { %319 = dma.vmem_to_hbm [thread:$0]  %s1662_s19, 16, %s307_s2, [#allocation4 + $0x7] }
 0x239   :  { %v391_v15 = vpop.f32.mrf.mxu0 }
 0x23a   :  { %v395_v16 = vadd.f32 %v391_v15, %v320_v14 }
 0x23b   :  { %v625_v17 = vpop.f32.mrf.mxu0 }
 0x23c   :  { %396 = vst [vmem:[#allocation10] sm:$0xff] %v395_v16 }
 0x23d   :  { %1065 = dma.done.wait [#allocation4], 16 }
 0x23e   :  { %1066 = vsyncadd [#allocation4], 4294967280 }
 0x23f   :  { %1067 = dma.done.wait [#allocation4 + $0x1], 16 }
 0x240   :  { %1068 = vsyncadd [#allocation4 + $0x1], 4294967280 }
 0x241   :  { %1069 = dma.done.wait [#allocation4 + $0x2], 16 }
 0x242   :  { %1070 = vsyncadd [#allocation4 + $0x2], 4294967280 }
 0x243   :  { %1071 = dma.done.wait [#allocation4 + $0x3], 16 }
 0x244   :  { %1072 = vsyncadd [#allocation4 + $0x3], 4294967280 }
 0x245   :  { %1073 = dma.done.wait [#allocation4 + $0x4], 16 }
 0x246   :  { %1074 = vsyncadd [#allocation4 + $0x4], 4294967280 }
 0x247   :  { %1075 = dma.done.wait [#allocation4 + $0x5], 16 }
 0x248   :  { %1076 = vsyncadd [#allocation4 + $0x5], 4294967280 }
 0x249   :  { %1077 = dma.done.wait [#allocation4 + $0x6], 16 }
 0x24a   :  { %1078 = vsyncadd [#allocation4 + $0x6], 4294967280 }
 0x24b   :  { %1079 = dma.done.wait [#allocation4 + $0x7], 16 }
 0x24c   :  { %1080 = vsyncadd [#allocation4 + $0x7], 4294967280  ;;  %s1095_s5 = smov [#allocation10]  }
 0x24d   :  { %s419_s3 = sshll.u32 %s1095_s5, 4  ;;  %s420_s3 = int_to_ptr.vmem [resolvable:$true] %s419_s3 }
 0x24e   :  { %s1025_s17 = scalar_lea.vmem %s420_s3, 128  ;;  %p1030_p2 = scmp.lt.s32.totalorder %s420_s3, %s420_s3 }
 0x24f   :  { %p1026_p10 = scmp.ne.s32.totalorder %s420_s3, %s1025_s17  ;;  %p1031_p3 = scmp.lt.s32.totalorder %s1025_s17, %s1025_s17 }
 0x251   :  { %p1032_p1 = por %p1031_p3, %p1030_p2 }
 0x253   :  { %p1033_p4 = pnand %p1032_p1, %p1026_p10 }
 0x255   :  { %1036 = shalt.err (!%p1033_p4)
}
 0x256   :  { %s1663_s16 = sld [smem:[#allocation77_spill]] }
 0x25c   :  { %422 = dma.vmem_to_hbm [thread:$0]  %s420_s3, 128, %s1663_s16, [#allocation9]  }
 0x25d   :  { %1081 = dma.done.wait [#allocation9], 128  }
 0x25e   :  { %1082 = vsyncadd [#allocation9], 4294967168 }
 0x25f   :  { %426 = vsyncpa [#allocation8], 1 }
 0x260   :  { %427 = vsyncpa [#allocation9], 1 }
 0x261   :  { %428 = vsyncmov [#allocation3] }
 0x264   :  { %s429_s6 = vpop.sfrf %428 }
 0x265   :  { %p603_p8 = scmp.ne.s32.totalorder %s429_s6, 0 }
 0x267   :  { %433 = shalt.err (%p603_p8)  }
 0x268   :  { %435 = vsyncmov [#allocation3 + $0x1] }
 0x26b   :  { %s436_s26 = vpop.sfrf %435 }
 0x26c   :  { %p604_p13 = scmp.ne.s32.totalorder %s436_s26, 0 }
 0x26e   :  { %440 = shalt.err (%p604_p13)  }
 0x26f   :  { %442 = vsyncmov [#allocation3 + $0x2] }
 0x272   :  { %s443_s24 = vpop.sfrf %442 }
 0x273   :  { %p605_p12 = scmp.ne.s32.totalorder %s443_s24, 0 }
 0x275   :  { %447 = shalt.err (%p605_p12)  }
 0x276   :  { %449 = vsyncmov [#allocation3 + $0x3] }
 0x279   :  { %s450_s15 = vpop.sfrf %449 }
 0x27a   :  { %p606_p5 = scmp.ne.s32.totalorder %s450_s15, 0 }
 0x27c   :  { %454 = shalt.err (%p606_p5)  }
 0x27d   :  { %456 = vsyncmov [#allocation3 + $0x4] }
 0x280   :  { %s457_s29 = vpop.sfrf %456 }
 0x281   :  { %p607_p11 = scmp.ne.s32.totalorder %s457_s29, 0 }
 0x283   :  { %461 = shalt.err (%p607_p11)  }
 0x284   :  { %463 = vsyncmov [#allocation3 + $0x5] }
 0x287   :  { %s464_s25 = vpop.sfrf %463 }
 0x288   :  { %p608_p0 = scmp.ne.s32.totalorder %s464_s25, 0 }
 0x28a   :  { %468 = shalt.err (%p608_p0)  }
 0x28b   :  { %470 = vsyncmov [#allocation3 + $0x6] }
 0x28e   :  { %s471_s7 = vpop.sfrf %470 }
 0x28f   :  { %p609_p7 = scmp.ne.s32.totalorder %s471_s7, 0 }
 0x291   :  { %475 = shalt.err (%p609_p7)  }
 0x292   :  { %477 = vsyncmov [#allocation3 + $0x7] }
 0x295   :  { %s478_s13 = vpop.sfrf %477 }
 0x296   :  { %p610_p9 = scmp.ne.s32.totalorder %s478_s13, 0 }
 0x298   :  { %482 = shalt.err (%p610_p9)  }
 0x299   :  { %483 = vsyncmov [#allocation4] }
 0x29c   :  { %s484_s8 = vpop.sfrf %483 }
 0x29d   :  { %p611_p6 = scmp.ne.s32.totalorder %s484_s8, 0 }
 0x29f   :  { %488 = shalt.err (%p611_p6)  }
 0x2a0   :  { %490 = vsyncmov [#allocation4 + $0x1] }
 0x2a3   :  { %s491_s21 = vpop.sfrf %490 }
 0x2a4   :  { %p612_p10 = scmp.ne.s32.totalorder %s491_s21, 0 }
 0x2a6   :  { %495 = shalt.err (%p612_p10)  }
 0x2a7   :  { %497 = vsyncmov [#allocation4 + $0x2] }
 0x2aa   :  { %s498_s12 = vpop.sfrf %497 }
 0x2ab   :  { %p613_p2 = scmp.ne.s32.totalorder %s498_s12, 0 }
 0x2ad   :  { %502 = shalt.err (%p613_p2)  }
 0x2ae   :  { %504 = vsyncmov [#allocation4 + $0x3] }
 0x2b1   :  { %s505_s11 = vpop.sfrf %504 }
 0x2b2   :  { %p614_p3 = scmp.ne.s32.totalorder %s505_s11, 0 }
 0x2b4   :  { %509 = shalt.err (%p614_p3)  }
 0x2b5   :  { %511 = vsyncmov [#allocation4 + $0x4] }
 0x2b8   :  { %s512_s9 = vpop.sfrf %511 }
 0x2b9   :  { %p615_p1 = scmp.ne.s32.totalorder %s512_s9, 0 }
 0x2bb   :  { %516 = shalt.err (%p615_p1)  }
 0x2bc   :  { %518 = vsyncmov [#allocation4 + $0x5] }
 0x2bf   :  { %s519_s14 = vpop.sfrf %518 }
 0x2c0   :  { %p616_p4 = scmp.ne.s32.totalorder %s519_s14, 0 }
 0x2c2   :  { %523 = shalt.err (%p616_p4)  }
 0x2c3   :  { %525 = vsyncmov [#allocation4 + $0x6] }
 0x2c6   :  { %s526_s10 = vpop.sfrf %525 }
 0x2c7   :  { %p617_p8 = scmp.ne.s32.totalorder %s526_s10, 0 }
 0x2c9   :  { %530 = shalt.err (%p617_p8)  }
 0x2ca   :  { %532 = vsyncmov [#allocation4 + $0x7] }
 0x2cd   :  { %s533_s4 = vpop.sfrf %532 }
 0x2ce   :  { %p618_p13 = scmp.ne.s32.totalorder %s533_s4, 0 }
 0x2d0   :  { %537 = shalt.err (%p618_p13)  }

</bundles_post_ra>
